<compile_context>
chip_gen: v7x
topology: tpu7x:2x2x1
jax: 0.10.0
libtpu: 0.0.40
codegen_flags: <defaults>
</compile_context>

<pallas_src>
import functools

import jax
import jax.numpy as jnp
from jax.experimental import pallas as pl
from jax.experimental.pallas import tpu as pltpu

SMOOTH = 1e-4   # default `smooth` argument of forward()
BN_EPS = 1e-5   # nn.BatchNorm2d default eps


def _largest_tile(total, cap, multiple=8):
    """Largest multiple-of-`multiple` divisor of `total` that is <= cap."""
    best = None
    t = multiple
    while t <= min(total, cap):
        if total % t == 0:
            best = t
        t += multiple
    return best if best is not None else total


# ----------------------------------------------------------------------------
# Kernel 1: per-batch fused QKV projection + cosine-like attention (all heads).
# ----------------------------------------------------------------------------
def _attention_kernel(x_ref, w_ref, o_ref, *, heads, dim_head, kv_tile):
    x = x_ref[0]          # (N, dim)        bf16
    w = w_ref[...]        # (dim, 3*inner)  bf16 (resident across the grid)
    inner = heads * dim_head
    N = x.shape[0]

    # One lane-dense MXU matmul produces q, k, v of every head at once.
    qkv = jnp.dot(x, w, preferred_element_type=jnp.float32)   # (N, 3*inner) f32

    head_outs = []
    for g in range(heads):                                     # static loop
        q = qkv[:, g * dim_head:(g + 1) * dim_head]                        # (N, dh)
        k = qkv[:, inner + g * dim_head:inner + (g + 1) * dim_head]        # (N, dh)
        v = qkv[:, 2 * inner + g * dim_head:2 * inner + (g + 1) * dim_head]

        # Norms / denominator kept in f32 (faithful to the PyTorch forward).
        qn = jnp.sqrt(jnp.sum(q * q, axis=-1, keepdims=True) + SMOOTH)     # (N, 1)
        kn = jnp.sqrt(jnp.sum(k * k, axis=-1, keepdims=True) + SMOOTH)     # (N, 1)
        kn_t = kn.T                                                        # (1, N)

        q_b = q.astype(jnp.bfloat16)
        k_b = k.astype(jnp.bfloat16)
        v_b = v.astype(jnp.bfloat16)

        acc = jnp.zeros((N, dim_head), jnp.float32)
        # KV-chunked: the attention intermediate is at most (N, kv_tile).
        for c in range(N // kv_tile):
            sl = slice(c * kv_tile, (c + 1) * kv_tile)
            s = jax.lax.dot_general(                                       # (N, tk)
                q_b, k_b[sl], (((1,), (1,)), ((), ())),
                preferred_element_type=jnp.float32)
            s = s / (qn * kn_t[:, sl] + SMOOTH)
            acc = acc + jnp.dot(s.astype(jnp.bfloat16), v_b[sl],
                                preferred_element_type=jnp.float32)
        head_outs.append(acc)

    # (N, inner) lane-dense store; already the 'b (h w) (g d)' layout the
    # second stage consumes, so no HBM transpose is needed downstream.
    o_ref[0] = jnp.concatenate(head_outs, axis=-1).astype(o_ref.dtype)


# ----------------------------------------------------------------------------
# Kernel 2: tiled to_out 1x1-conv matmul + per-channel sum / sum-of-squares
#           accumulation (BN training statistics, pass 1).
# ----------------------------------------------------------------------------
def _proj_stats_kernel(a_ref, w_ref, y_ref, sum_ref, sq_ref):
    @pl.when(pl.program_id(0) == 0)
    def _():
        sum_ref[...] = jnp.zeros_like(sum_ref)
        sq_ref[...] = jnp.zeros_like(sq_ref)

    y = jnp.dot(a_ref[...], w_ref[...],
                preferred_element_type=jnp.float32)            # (rt, dim)
    y_ref[...] = y
    sum_ref[...] += jnp.sum(y, axis=0, keepdims=True)          # (1, dim)
    sq_ref[...] += jnp.sum(y * y, axis=0, keepdims=True)       # (1, dim)


# ----------------------------------------------------------------------------
# Kernel 3: BatchNorm (batch stats, gamma=1, beta=0) + ReLU, per row tile.
# ----------------------------------------------------------------------------
def _bn_relu_kernel(y_ref, sum_ref, sq_ref, o_ref, *, inv_n):
    mean = sum_ref[...] * inv_n                                # (1, dim)
    var = sq_ref[...] * inv_n - mean * mean                    # biased (BN train)
    inv_std = jax.lax.rsqrt(var + BN_EPS)
    o_ref[...] = jnp.maximum((y_ref[...] - mean) * inv_std,
                             0.0).astype(o_ref.dtype)


# ----------------------------------------------------------------------------
# Wrapper
# ----------------------------------------------------------------------------
@functools.partial(jax.jit, static_argnames=("heads", "dim_head"))
def cnn_attention_forward(x_nchw, w_qkv, w_out, *, heads, dim_head):
    """x_nchw: (B, dim, H, W); w_qkv: (3*inner, dim); w_out: (dim, inner)."""
    B, dim, H, W = x_nchw.shape
    N = H * W
    inner = heads * dim_head

    # NCHW -> (B, N, dim), N flattened row-major (h*W + w)
    x_flat = jnp.transpose(x_nchw.reshape(B, dim, N), (0, 2, 1))
    x_bf16 = x_flat.astype(jnp.bfloat16)

    # to_qkv weight (3*inner, dim) -> (dim, 3*inner) so the kernel does x @ w.
    # After the transpose the column layout already matches chunk(3, dim=1) +
    # the per-head 'b (g d) h w' indexing: cols [0:inner]=q, [inner:2*inner]=k,
    # [2*inner:3*inner]=v, each head-major (g*dim_head + d).
    w_qkv_t = jnp.transpose(w_qkv).astype(jnp.bfloat16)          # (dim, 3*inner)

    kv_tile = _largest_tile(N, 512)

    # Rough per-grid-step VMEM estimate (incl. double buffering) so moderate N
    # still compiles on v6e default scoped limits; capped at 64 MiB for v7x.
    est = 2 * (N * dim * 2 + dim * 3 * inner * 2)    # bf16 inputs, double-buf
    est += N * 3 * inner * 4                         # qkv f32
    est += 2 * N * inner * 4                         # output block, double-buf
    est += 2 * N * kv_tile * 4                       # attention chunk temps
    est += 8 * N * dim_head * 4                      # q/k/v copies + accumulator
    vmem_limit = int(min(64 * 1024 * 1024, max(2 * est, 16 * 1024 * 1024)))

    attn_out = pl.pallas_call(
        functools.partial(_attention_kernel, heads=heads, dim_head=dim_head,
                          kv_tile=kv_tile),
        out_shape=jax.ShapeDtypeStruct((B, N, inner), jnp.float32),
        grid=(B,),
        in_specs=[
            pl.BlockSpec((1, N, dim), lambda b: (b, 0, 0)),
            pl.BlockSpec((dim, 3 * inner), lambda b: (0, 0)),   # resident weight
        ],
        out_specs=pl.BlockSpec((1, N, inner), lambda b: (b, 0, 0)),
        compiler_params=pltpu.CompilerParams(
            dimension_semantics=("parallel",),
            vmem_limit_bytes=vmem_limit),
    )(x_bf16, w_qkv_t)

    # 'b g (h w) d -> b (g d) h w' was already produced channels-last by the
    # kernel, so this reshape is a free contiguous view: (B, N, inner) -> (B*N, inner).
    a_flat = attn_out.reshape(B * N, inner)
    w_out_t = jnp.transpose(w_out)                               # (inner, dim)

    rows = B * N
    rt = _largest_tile(rows, 512)
    n_tiles = rows // rt

    y_full, ch_sum, ch_sq = pl.pallas_call(
        _proj_stats_kernel,
        out_shape=(jax.ShapeDtypeStruct((rows, dim), jnp.float32),
                   jax.ShapeDtypeStruct((1, dim), jnp.float32),
                   jax.ShapeDtypeStruct((1, dim), jnp.float32)),
        grid=(n_tiles,),
        in_specs=[
            pl.BlockSpec((rt, inner), lambda i: (i, 0)),
            pl.BlockSpec((inner, dim), lambda i: (0, 0)),
        ],
        out_specs=(
            pl.BlockSpec((rt, dim), lambda i: (i, 0)),
            pl.BlockSpec((1, dim), lambda i: (0, 0)),   # resident accumulators
            pl.BlockSpec((1, dim), lambda i: (0, 0)),
        ),
        compiler_params=pltpu.CompilerParams(
            dimension_semantics=("arbitrary",)),        # stats reduce over tiles
    )(a_flat, w_out_t)

    y_norm = pl.pallas_call(
        functools.partial(_bn_relu_kernel, inv_n=1.0 / rows),
        out_shape=jax.ShapeDtypeStruct((rows, dim), jnp.float32),
        grid=(n_tiles,),
        in_specs=[
            pl.BlockSpec((rt, dim), lambda i: (i, 0)),
            pl.BlockSpec((1, dim), lambda i: (0, 0)),
            pl.BlockSpec((1, dim), lambda i: (0, 0)),
        ],
        out_specs=pl.BlockSpec((rt, dim), lambda i: (i, 0)),
        compiler_params=pltpu.CompilerParams(
            dimension_semantics=("parallel",)),
    )(y_full, ch_sum, ch_sq)

    # back to NCHW
    y = jnp.transpose(y_norm.reshape(B, N, dim), (0, 2, 1)).reshape(B, dim, H, W)
    return y


# ----------------------------------------------------------------------------
# Pure-JAX reference (mirrors the PyTorch forward, mode='train', f32)
# ----------------------------------------------------------------------------
def cnn_attention_reference(x_nchw, w_qkv, w_out, *, heads, dim_head):
    B, dim, H, W = x_nchw.shape
    N = H * W
    inner = heads * dim_head
    x_flat = jnp.transpose(x_nchw.reshape(B, dim, N), (0, 2, 1))      # (B,N,dim)
    qkv = x_flat @ w_qkv.T                                            # (B,N,3*inner)
    q, k, v = jnp.split(qkv, 3, axis=-1)

    def to_heads(t):
        return jnp.transpose(t.reshape(B, N, heads, dim_head), (0, 2, 1, 3))

    q, k, v = map(to_heads, (q, k, v))
    attn = jnp.einsum("bgnd,bgmd->bgnm", q, k)
    qn = jnp.sqrt(jnp.sum(q ** 2, -1) + SMOOTH)[:, :, :, None]
    kn = jnp.sqrt(jnp.sum(k ** 2, -1) + SMOOTH)[:, :, None, :]
    attn = attn / (qn * kn + SMOOTH)
    out = jnp.einsum("bgnm,bgmd->bgnd", attn, v)
    out_flat = jnp.transpose(out, (0, 2, 1, 3)).reshape(B * N, inner)
    y = out_flat @ w_out.T
    mean = y.mean(0, keepdims=True)
    var = ((y - mean) ** 2).mean(0, keepdims=True)
    y = jnp.maximum((y - mean) / jnp.sqrt(var + BN_EPS), 0.0)
    return jnp.transpose(y.reshape(B, N, dim), (0, 2, 1)).reshape(B, dim, H, W)


if __name__ == "__main__":
    # Small, forward-consistent shapes.
    B, dim, H, W = 2, 32, 8, 8          # input: (B, dim, H, W), NCHW
    heads, dim_head = 2, 32
    inner = heads * dim_head

    key = jax.random.PRNGKey(0)
    kx, kq, ko = jax.random.split(key, 3)
    x = jax.random.normal(kx, (B, dim, H, W), jnp.float32)
    # to_qkv: Conv2d(dim, inner*3, 1, bias=False) -> weight (3*inner, dim)
    w_qkv = 0.1 * jax.random.normal(kq, (3 * inner, dim), jnp.float32)
    # to_out[0]: Conv2d(inner, dim, 1, bias=False) -> weight (dim, inner)
    w_out = 0.1 * jax.random.normal(ko, (dim, inner), jnp.float32)
    # self.headsita / self.sig / self.scale are unused in forward(); not materialized.

    y = cnn_attention_forward(x, w_qkv, w_out, heads=heads, dim_head=dim_head)
    y = jax.block_until_ready(y)

    y_ref = cnn_attention_reference(x, w_qkv, w_out, heads=heads,
                                    dim_head=dim_head)

    assert y.shape == (B, dim, H, W), y.shape
    assert bool(jnp.all(jnp.isfinite(y)))
    # bf16 MXU operands (f32 accumulation) -> slightly looser tolerance than f32.
    assert bool(jnp.allclose(y, y_ref, rtol=3e-2, atol=3e-2)), (
        float(jnp.max(jnp.abs(y - y_ref))))
    print("KERNEL_OK")
</pallas_src>

<mosaic_0001>
module attributes {stable_mosaic.version = 11 : i64} {
  func.func @_attention_kernel(%arg0: i32, %arg1: memref<1x64x32xbf16, #tpu.memory_space<vmem>>, %arg2: memref<32x192xbf16, #tpu.memory_space<vmem>>, %arg3: memref<1x64x64xf32, #tpu.memory_space<vmem>>) attributes {dimension_semantics = [#tpu.dimension_semantics<parallel>], iteration_bounds = array<i64: 2>, scalar_prefetch = 0 : i64, scratch_operands = 0 : i64, tpu.core_type = #tpu.core_type<tc>, window_params = [{transform_indices = @transform_0, window_bounds = array<i64: 1, 64, 32>}, {pipeline_mode = #tpu.pipeline_mode<synchronous>, transform_indices = @transform_1, window_bounds = array<i64: 32, 192>}, {transform_indices = @transform_2, window_bounds = array<i64: 1, 64, 64>}]} {
    %c0 = arith.constant 0 : index
    %c0_0 = arith.constant 0 : index
    %c0_1 = arith.constant 0 : index
    %0 = vector.load %arg1[%c0, %c0_0, %c0_1] : memref<1x64x32xbf16, #tpu.memory_space<vmem>>, vector<1x64x32xbf16>
    %1 = vector.shape_cast %0 : vector<1x64x32xbf16> to vector<64x32xbf16>
    %c0_2 = arith.constant 0 : index
    %c0_3 = arith.constant 0 : index
    %2 = vector.load %arg2[%c0_2, %c0_3] : memref<32x192xbf16, #tpu.memory_space<vmem>>, vector<32x192xbf16>
    %cst = arith.constant dense<0.000000e+00> : vector<64x192xf32>
    %3 = tpu.matmul %1, %2, %cst {dimension_numbers = #tpu.dot_dimension_numbers<[1], [0], [0], [1], [0, 0, 1, 1], [], []>} : vector<64x32xbf16>, vector<32x192xbf16>, vector<64x192xf32> -> vector<64x192xf32>
    %4 = vector.extract_strided_slice %3 {offsets = [0, 0], sizes = [64, 32], strides = [1, 1]} : vector<64x192xf32> to vector<64x32xf32>
    %5 = vector.extract_strided_slice %3 {offsets = [0, 64], sizes = [64, 32], strides = [1, 1]} : vector<64x192xf32> to vector<64x32xf32>
    %6 = vector.extract_strided_slice %3 {offsets = [0, 128], sizes = [64, 32], strides = [1, 1]} : vector<64x192xf32> to vector<64x32xf32>
    %7 = arith.mulf %4, %4 : vector<64x32xf32>
    %cst_4 = arith.constant dense<0.000000e+00> : vector<64xf32>
    %8 = vector.multi_reduction <add>, %7, %cst_4 [1] : vector<64x32xf32> to vector<64xf32>
    %9 = vector.shape_cast %8 : vector<64xf32> to vector<64x1xf32>
    %cst_5 = arith.constant 9.99999974E-5 : f32
    %10 = vector.broadcast %cst_5 : f32 to vector<64x1xf32>
    %11 = arith.addf %9, %10 : vector<64x1xf32>
    %12 = math.sqrt %11 : vector<64x1xf32>
    %13 = arith.mulf %5, %5 : vector<64x32xf32>
    %cst_6 = arith.constant dense<0.000000e+00> : vector<64xf32>
    %14 = vector.multi_reduction <add>, %13, %cst_6 [1] : vector<64x32xf32> to vector<64xf32>
    %15 = vector.shape_cast %14 : vector<64xf32> to vector<64x1xf32>
    %cst_7 = arith.constant 9.99999974E-5 : f32
    %16 = vector.broadcast %cst_7 : f32 to vector<64x1xf32>
    %17 = arith.addf %15, %16 : vector<64x1xf32>
    %18 = math.sqrt %17 : vector<64x1xf32>
    %19 = tpu.transpose %18, [1, 0] : vector<64x1xf32> -> vector<1x64xf32>
    %20 = arith.truncf %4 : vector<64x32xf32> to vector<64x32xbf16>
    %21 = arith.truncf %5 : vector<64x32xf32> to vector<64x32xbf16>
    %22 = arith.truncf %6 : vector<64x32xf32> to vector<64x32xbf16>
    %cst_8 = arith.constant 0.000000e+00 : f32
    %23 = vector.broadcast %cst_8 : f32 to vector<64x32xf32>
    %cst_9 = arith.constant dense<0.000000e+00> : vector<64x64xf32>
    %24 = tpu.matmul %20, %21, %cst_9 {dimension_numbers = #tpu.dot_dimension_numbers<[1], [1], [0], [0], [0, 0, 1, 0], [], []>} : vector<64x32xbf16>, vector<64x32xbf16>, vector<64x64xf32> -> vector<64x64xf32>
    %25 = vector.broadcast %12 : vector<64x1xf32> to vector<64x64xf32>
    %26 = vector.broadcast %19 : vector<1x64xf32> to vector<64x64xf32>
    %27 = arith.mulf %25, %26 : vector<64x64xf32>
    %cst_10 = arith.constant 9.99999974E-5 : f32
    %28 = vector.broadcast %cst_10 : f32 to vector<64x64xf32>
    %29 = arith.addf %27, %28 : vector<64x64xf32>
    %30 = arith.divf %24, %29 : vector<64x64xf32>
    %31 = arith.truncf %30 : vector<64x64xf32> to vector<64x64xbf16>
    %cst_11 = arith.constant dense<0.000000e+00> : vector<64x32xf32>
    %32 = tpu.matmul %31, %22, %cst_11 {dimension_numbers = #tpu.dot_dimension_numbers<[1], [0], [0], [1], [0, 0, 1, 1], [], []>} : vector<64x64xbf16>, vector<64x32xbf16>, vector<64x32xf32> -> vector<64x32xf32>
    %33 = arith.addf %23, %32 : vector<64x32xf32>
    %34 = vector.extract_strided_slice %3 {offsets = [0, 32], sizes = [64, 32], strides = [1, 1]} : vector<64x192xf32> to vector<64x32xf32>
    %35 = vector.extract_strided_slice %3 {offsets = [0, 96], sizes = [64, 32], strides = [1, 1]} : vector<64x192xf32> to vector<64x32xf32>
    %36 = vector.extract_strided_slice %3 {offsets = [0, 160], sizes = [64, 32], strides = [1, 1]} : vector<64x192xf32> to vector<64x32xf32>
    %37 = arith.mulf %34, %34 : vector<64x32xf32>
    %cst_12 = arith.constant dense<0.000000e+00> : vector<64xf32>
    %38 = vector.multi_reduction <add>, %37, %cst_12 [1] : vector<64x32xf32> to vector<64xf32>
    %39 = vector.shape_cast %38 : vector<64xf32> to vector<64x1xf32>
    %cst_13 = arith.constant 9.99999974E-5 : f32
    %40 = vector.broadcast %cst_13 : f32 to vector<64x1xf32>
    %41 = arith.addf %39, %40 : vector<64x1xf32>
    %42 = math.sqrt %41 : vector<64x1xf32>
    %43 = arith.mulf %35, %35 : vector<64x32xf32>
    %cst_14 = arith.constant dense<0.000000e+00> : vector<64xf32>
    %44 = vector.multi_reduction <add>, %43, %cst_14 [1] : vector<64x32xf32> to vector<64xf32>
    %45 = vector.shape_cast %44 : vector<64xf32> to vector<64x1xf32>
    %cst_15 = arith.constant 9.99999974E-5 : f32
    %46 = vector.broadcast %cst_15 : f32 to vector<64x1xf32>
    %47 = arith.addf %45, %46 : vector<64x1xf32>
    %48 = math.sqrt %47 : vector<64x1xf32>
    %49 = tpu.transpose %48, [1, 0] : vector<64x1xf32> -> vector<1x64xf32>
    %50 = arith.truncf %34 : vector<64x32xf32> to vector<64x32xbf16>
    %51 = arith.truncf %35 : vector<64x32xf32> to vector<64x32xbf16>
    %52 = arith.truncf %36 : vector<64x32xf32> to vector<64x32xbf16>
    %cst_16 = arith.constant 0.000000e+00 : f32
    %53 = vector.broadcast %cst_16 : f32 to vector<64x32xf32>
    %cst_17 = arith.constant dense<0.000000e+00> : vector<64x64xf32>
    %54 = tpu.matmul %50, %51, %cst_17 {dimension_numbers = #tpu.dot_dimension_numbers<[1], [1], [0], [0], [0, 0, 1, 0], [], []>} : vector<64x32xbf16>, vector<64x32xbf16>, vector<64x64xf32> -> vector<64x64xf32>
    %55 = vector.broadcast %42 : vector<64x1xf32> to vector<64x64xf32>
    %56 = vector.broadcast %49 : vector<1x64xf32> to vector<64x64xf32>
    %57 = arith.mulf %55, %56 : vector<64x64xf32>
    %cst_18 = arith.constant 9.99999974E-5 : f32
    %58 = vector.broadcast %cst_18 : f32 to vector<64x64xf32>
    %59 = arith.addf %57, %58 : vector<64x64xf32>
    %60 = arith.divf %54, %59 : vector<64x64xf32>
    %61 = arith.truncf %60 : vector<64x64xf32> to vector<64x64xbf16>
    %cst_19 = arith.constant dense<0.000000e+00> : vector<64x32xf32>
    %62 = tpu.matmul %61, %52, %cst_19 {dimension_numbers = #tpu.dot_dimension_numbers<[1], [0], [0], [1], [0, 0, 1, 1], [], []>} : vector<64x64xbf16>, vector<64x32xbf16>, vector<64x32xf32> -> vector<64x32xf32>
    %63 = arith.addf %53, %62 : vector<64x32xf32>
    %64 = tpu.concatenate %33, %63 in 1 : vector<64x32xf32>, vector<64x32xf32> -> vector<64x64xf32>
    %c0_20 = arith.constant 0 : index
    %c0_21 = arith.constant 0 : index
    %c0_22 = arith.constant 0 : index
    %65 = vector.load %arg3[%c0_20, %c0_21, %c0_22] : memref<1x64x64xf32, #tpu.memory_space<vmem>>, vector<1x64x64xf32>
    %66 = vector.shape_cast %65 : vector<1x64x64xf32> to vector<64x64xf32>
    %67 = vector.shape_cast %64 : vector<64x64xf32> to vector<1x64x64xf32>
    tpu.vector_store %arg3[%c0_20, %c0_21, %c0_22], %67 {strides = array<i32>} : memref<1x64x64xf32, #tpu.memory_space<vmem>>, vector<1x64x64xf32>,
    return
  }
  func.func @transform_0(%arg0: i32) -> (i32, i32, i32) {
    %c0_i32 = arith.constant 0 : i32
    %c0_i32_0 = arith.constant 0 : i32
    %c0_i32_1 = arith.constant 0 : i32
    return %arg0, %c0_i32, %c0_i32_0 : i32, i32, i32
  }
  func.func @transform_1(%arg0: i32) -> (i32, i32) {
    %c0_i32 = arith.constant 0 : i32
    %c0_i32_0 = arith.constant 0 : i32
    %c0_i32_1 = arith.constant 0 : i32
    return %c0_i32, %c0_i32_0 : i32, i32
  }
  func.func @transform_2(%arg0: i32) -> (i32, i32, i32) {
    %c0_i32 = arith.constant 0 : i32
    %c0_i32_0 = arith.constant 0 : i32
    %c0_i32_1 = arith.constant 0 : i32
    return %arg0, %c0_i32, %c0_i32_0 : i32, i32, i32
  }
}

module attributes {stable_mosaic.version = 11 : i64} {
  func.func @_bn_relu_kernel(%arg0: i32, %arg1: memref<128x32xf32, #tpu.memory_space<vmem>>, %arg2: memref<1x32xf32, #tpu.memory_space<vmem>>, %arg3: memref<1x32xf32, #tpu.memory_space<vmem>>, %arg4: memref<128x32xf32, #tpu.memory_space<vmem>>) attributes {dimension_semantics = [#tpu.dimension_semantics<parallel>], iteration_bounds = array<i64: 1>, scalar_prefetch = 0 : i64, scratch_operands = 0 : i64, tpu.core_type = #tpu.core_type<tc>, window_params = [{transform_indices = @transform_0, window_bounds = array<i64: 128, 32>}, {pipeline_mode = #tpu.pipeline_mode<synchronous>, transform_indices = @transform_1, window_bounds = array<i64: 1, 32>}, {pipeline_mode = #tpu.pipeline_mode<synchronous>, transform_indices = @transform_2, window_bounds = array<i64: 1, 32>}, {transform_indices = @transform_3, window_bounds = array<i64: 128, 32>}]} {
    %c0 = arith.constant 0 : index
    %c0_0 = arith.constant 0 : index
    %0 = vector.load %arg2[%c0, %c0_0] : memref<1x32xf32, #tpu.memory_space<vmem>>, vector<1x32xf32>
    %cst = arith.constant 7.812500e-03 : f32
    %1 = vector.broadcast %cst : f32 to vector<1x32xf32>
    %2 = arith.mulf %0, %1 : vector<1x32xf32>
    %c0_1 = arith.constant 0 : index
    %c0_2 = arith.constant 0 : index
    %3 = vector.load %arg3[%c0_1, %c0_2] : memref<1x32xf32, #tpu.memory_space<vmem>>, vector<1x32xf32>
    %cst_3 = arith.constant 7.812500e-03 : f32
    %4 = vector.broadcast %cst_3 : f32 to vector<1x32xf32>
    %5 = arith.mulf %3, %4 : vector<1x32xf32>
    %6 = arith.mulf %2, %2 : vector<1x32xf32>
    %7 = arith.subf %5, %6 : vector<1x32xf32>
    %cst_4 = arith.constant 9.99999974E-6 : f32
    %8 = vector.broadcast %cst_4 : f32 to vector<1x32xf32>
    %9 = arith.addf %7, %8 : vector<1x32xf32>
    %10 = math.rsqrt %9 : vector<1x32xf32>
    %c0_5 = arith.constant 0 : index
    %c0_6 = arith.constant 0 : index
    %11 = vector.load %arg1[%c0_5, %c0_6] : memref<128x32xf32, #tpu.memory_space<vmem>>, vector<128x32xf32>
    %12 = vector.broadcast %2 : vector<1x32xf32> to vector<128x32xf32>
    %13 = arith.subf %11, %12 : vector<128x32xf32>
    %14 = vector.broadcast %10 : vector<1x32xf32> to vector<128x32xf32>
    %15 = arith.mulf %13, %14 : vector<128x32xf32>
    %cst_7 = arith.constant 0.000000e+00 : f32
    %16 = vector.broadcast %cst_7 : f32 to vector<128x32xf32>
    %17 = arith.maximumf %15, %16 : vector<128x32xf32>
    %c0_8 = arith.constant 0 : index
    %c0_9 = arith.constant 0 : index
    %18 = vector.load %arg4[%c0_8, %c0_9] : memref<128x32xf32, #tpu.memory_space<vmem>>, vector<128x32xf32>
    tpu.vector_store %arg4[%c0_8, %c0_9], %17 {strides = array<i32>} : memref<128x32xf32, #tpu.memory_space<vmem>>, vector<128x32xf32>,
    return
  }
  func.func @transform_0(%arg0: i32) -> (i32, i32) {
    %c0_i32 = arith.constant 0 : i32
    %c0_i32_0 = arith.constant 0 : i32
    return %arg0, %c0_i32 : i32, i32
  }
  func.func @transform_1(%arg0: i32) -> (i32, i32) {
    %c0_i32 = arith.constant 0 : i32
    %c0_i32_0 = arith.constant 0 : i32
    %c0_i32_1 = arith.constant 0 : i32
    return %c0_i32, %c0_i32_0 : i32, i32
  }
  func.func @transform_2(%arg0: i32) -> (i32, i32) {
    %c0_i32 = arith.constant 0 : i32
    %c0_i32_0 = arith.constant 0 : i32
    %c0_i32_1 = arith.constant 0 : i32
    return %c0_i32, %c0_i32_0 : i32, i32
  }
  func.func @transform_3(%arg0: i32) -> (i32, i32) {
    %c0_i32 = arith.constant 0 : i32
    %c0_i32_0 = arith.constant 0 : i32
    return %arg0, %c0_i32 : i32, i32
  }
}

module attributes {stable_mosaic.version = 11 : i64} {
  func.func @_proj_stats_kernel(%arg0: i32, %arg1: memref<128x64xf32, #tpu.memory_space<vmem>>, %arg2: memref<64x32xf32, #tpu.memory_space<vmem>>, %arg3: memref<128x32xf32, #tpu.memory_space<vmem>>, %arg4: memref<1x32xf32, #tpu.memory_space<vmem>>, %arg5: memref<1x32xf32, #tpu.memory_space<vmem>>) attributes {dimension_semantics = [#tpu.dimension_semantics<arbitrary>], iteration_bounds = array<i64: 1>, scalar_prefetch = 0 : i64, scratch_operands = 0 : i64, tpu.core_type = #tpu.core_type<tc>, window_params = [{transform_indices = @transform_0, window_bounds = array<i64: 128, 64>}, {pipeline_mode = #tpu.pipeline_mode<synchronous>, transform_indices = @transform_1, window_bounds = array<i64: 64, 32>}, {transform_indices = @transform_2, window_bounds = array<i64: 128, 32>}, {pipeline_mode = #tpu.pipeline_mode<synchronous>, transform_indices = @transform_3, window_bounds = array<i64: 1, 32>}, {pipeline_mode = #tpu.pipeline_mode<synchronous>, transform_indices = @transform_4, window_bounds = array<i64: 1, 32>}]} {
    %c0_i32 = arith.constant 0 : i32
    %0 = arith.cmpi eq, %arg0, %c0_i32 : i32
    %1 = arith.extui %0 : i1 to i32
    %c0_i32_0 = arith.constant 0 : i32
    %2 = arith.cmpi ne, %1, %c0_i32_0 : i32
    scf.if %2 {
      %cst_16 = arith.constant 0.000000e+00 : f32
      %18 = vector.broadcast %cst_16 : f32 to vector<1x32xf32>
      %c0_17 = arith.constant 0 : index
      %c0_18 = arith.constant 0 : index
      %19 = vector.load %arg4[%c0_17, %c0_18] : memref<1x32xf32, #tpu.memory_space<vmem>>, vector<1x32xf32>
      tpu.vector_store %arg4[%c0_17, %c0_18], %18 {strides = array<i32>} : memref<1x32xf32, #tpu.memory_space<vmem>>, vector<1x32xf32>,
      %cst_19 = arith.constant 0.000000e+00 : f32
      %20 = vector.broadcast %cst_19 : f32 to vector<1x32xf32>
      %c0_20 = arith.constant 0 : index
      %c0_21 = arith.constant 0 : index
      %21 = vector.load %arg5[%c0_20, %c0_21] : memref<1x32xf32, #tpu.memory_space<vmem>>, vector<1x32xf32>
      tpu.vector_store %arg5[%c0_20, %c0_21], %20 {strides = array<i32>} : memref<1x32xf32, #tpu.memory_space<vmem>>, vector<1x32xf32>,
    } else {
    }
    %c0 = arith.constant 0 : index
    %c0_1 = arith.constant 0 : index
    %3 = vector.load %arg1[%c0, %c0_1] : memref<128x64xf32, #tpu.memory_space<vmem>>, vector<128x64xf32>
    %c0_2 = arith.constant 0 : index
    %c0_3 = arith.constant 0 : index
    %4 = vector.load %arg2[%c0_2, %c0_3] : memref<64x32xf32, #tpu.memory_space<vmem>>, vector<64x32xf32>
    %cst = arith.constant dense<0.000000e+00> : vector<128x32xf32>
    %5 = tpu.matmul %3, %4, %cst {dimension_numbers = #tpu.dot_dimension_numbers<[1], [0], [0], [1], [0, 0, 1, 1], [], []>} : vector<128x64xf32>, vector<64x32xf32>, vector<128x32xf32> -> vector<128x32xf32>
    %c0_4 = arith.constant 0 : index
    %c0_5 = arith.constant 0 : index
    %6 = vector.load %arg3[%c0_4, %c0_5] : memref<128x32xf32, #tpu.memory_space<vmem>>, vector<128x32xf32>
    tpu.vector_store %arg3[%c0_4, %c0_5], %5 {strides = array<i32>} : memref<128x32xf32, #tpu.memory_space<vmem>>, vector<128x32xf32>,
    %c0_6 = arith.constant 0 : index
    %c0_7 = arith.constant 0 : index
    %7 = vector.load %arg4[%c0_6, %c0_7] : memref<1x32xf32, #tpu.memory_space<vmem>>, vector<1x32xf32>
    %cst_8 = arith.constant dense<0.000000e+00> : vector<32xf32>
    %8 = vector.multi_reduction <add>, %5, %cst_8 [0] : vector<128x32xf32> to vector<32xf32>
    %9 = vector.shape_cast %8 : vector<32xf32> to vector<1x32xf32>
    %10 = arith.addf %7, %9 : vector<1x32xf32>
    %c0_9 = arith.constant 0 : index
    %c0_10 = arith.constant 0 : index
    %11 = vector.load %arg4[%c0_9, %c0_10] : memref<1x32xf32, #tpu.memory_space<vmem>>, vector<1x32xf32>
    tpu.vector_store %arg4[%c0_9, %c0_10], %10 {strides = array<i32>} : memref<1x32xf32, #tpu.memory_space<vmem>>, vector<1x32xf32>,
    %c0_11 = arith.constant 0 : index
    %c0_12 = arith.constant 0 : index
    %12 = vector.load %arg5[%c0_11, %c0_12] : memref<1x32xf32, #tpu.memory_space<vmem>>, vector<1x32xf32>
    %13 = arith.mulf %5, %5 : vector<128x32xf32>
    %cst_13 = arith.constant dense<0.000000e+00> : vector<32xf32>
    %14 = vector.multi_reduction <add>, %13, %cst_13 [0] : vector<128x32xf32> to vector<32xf32>
    %15 = vector.shape_cast %14 : vector<32xf32> to vector<1x32xf32>
    %16 = arith.addf %12, %15 : vector<1x32xf32>
    %c0_14 = arith.constant 0 : index
    %c0_15 = arith.constant 0 : index
    %17 = vector.load %arg5[%c0_14, %c0_15] : memref<1x32xf32, #tpu.memory_space<vmem>>, vector<1x32xf32>
    tpu.vector_store %arg5[%c0_14, %c0_15], %16 {strides = array<i32>} : memref<1x32xf32, #tpu.memory_space<vmem>>, vector<1x32xf32>,
    return
  }
  func.func @transform_0(%arg0: i32) -> (i32, i32) {
    %c0_i32 = arith.constant 0 : i32
    %c0_i32_0 = arith.constant 0 : i32
    return %arg0, %c0_i32 : i32, i32
  }
  func.func @transform_1(%arg0: i32) -> (i32, i32) {
    %c0_i32 = arith.constant 0 : i32
    %c0_i32_0 = arith.constant 0 : i32
    %c0_i32_1 = arith.constant 0 : i32
    return %c0_i32, %c0_i32_0 : i32, i32
  }
  func.func @transform_2(%arg0: i32) -> (i32, i32) {
    %c0_i32 = arith.constant 0 : i32
    %c0_i32_0 = arith.constant 0 : i32
    return %arg0, %c0_i32 : i32, i32
  }
  func.func @transform_3(%arg0: i32) -> (i32, i32) {
    %c0_i32 = arith.constant 0 : i32
    %c0_i32_0 = arith.constant 0 : i32
    %c0_i32_1 = arith.constant 0 : i32
    return %c0_i32, %c0_i32_0 : i32, i32
  }
  func.func @transform_4(%arg0: i32) -> (i32, i32) {
    %c0_i32 = arith.constant 0 : i32
    %c0_i32_0 = arith.constant 0 : i32
    %c0_i32_1 = arith.constant 0 : i32
    return %c0_i32, %c0_i32_0 : i32, i32
  }
}

</mosaic_0001>

<bundles_post_ra>
// kernel: cnn_attention_forward.5
= control target key start
LH: loop header
LB: loop body
LE: loop exit
PB: predicated region body
PF: predicated region fallthrough
CT: control target
= control target key end

     0   :  { %v40_v4 = vlaneseq  ;;  %s284_s0 = inlined_call_operand.vmem [shape: f32[128,32], index: 0, kind: input, shape index: {}]   ;;  %s285_s1 = inlined_call_operand.vmem [shape: f32[1,32], index: 1, kind: input, shape index: {}]   ;;  %s286_s2 = inlined_call_operand.vmem [shape: f32[1,32], index: 2, kind: input, shape index: {}]   ;;  %s287_s3 = inlined_call_operand.hbm [shape: f32[128,32], index: 3, kind: output, shape index: {}]  }
   0x1   :  { %v15_v0 = vld [vmem:[%s285_s1] sm:$0x1] }
   0x2   :  { %v17_v1 = vld [vmem:[%s286_s2] sm:$0x1]  ;;  %v16_v2 = vmul.f32 0.0078125, %v15_v0  ;;  %v41_v7 = vshrl.u32 %v40_v4, 7 }
   0x3   :  { %v18_v3 = vmul.f32 0.0078125, %v17_v1 }
   0x4   :  { %v19_v5 = vmul.f32 %v16_v2, %v16_v2 }
   0x6   :  { %v20_v6 = vsub.f32 %v18_v3, %v19_v5 }
   0x7   :  { %8 = vsyncpa [#allocation3], 0  ;;  %v42_v9 = vsub.s32 0, %v41_v7  ;;  %v23_v10 = vld [vmem:[%s284_s0] sm:$0xff]  ;;  %v24_v12 = vld [vmem:[%s284_s0 + $0x8] sm:$0xff]  ;;  %vm99_vm0 = vcmask 261120  }
   0x8   :  { %v21_v8 = vadd.f32 1e-05, %v20_v6  ;;  %v25_v13 = vld [vmem:[%s284_s0 + $0x10] sm:$0xff]  ;;  %v26_v14 = vld [vmem:[%s284_s0 + $0x18] sm:$0xff]  ;;  %v27_v15 = vld [vmem:[%s284_s0 + $0x20] sm:$0xff] }
   0x9   :  { %v193_v11 = vrot.slane %v16_v2, %v42_v9  ;;  %v28_v16 = vld [vmem:[%s284_s0 + $0x28] sm:$0xff]  ;;  %v29_v17 = vld [vmem:[%s284_s0 + $0x30] sm:$0xff]  ;;  %v30_v18 = vld [vmem:[%s284_s0 + $0x38] sm:$0xff] }
   0xa   :  { %135 = vrsqrt.f32 %v21_v8  ;;  %v31_v19 = vld [vmem:[%s284_s0 + $0x40] sm:$0xff]  ;;  %v32_v20 = vld [vmem:[%s284_s0 + $0x48] sm:$0xff]  ;;  %v33_v22 = vld [vmem:[%s284_s0 + $0x50] sm:$0xff] }
   0xb   :  { %v45_v21 = vsub.f32 %v23_v10, %v193_v11  ;;  %v34_v23 = vld [vmem:[%s284_s0 + $0x58] sm:$0xff]  ;;  %v35_v24 = vld [vmem:[%s284_s0 + $0x60] sm:$0xff]  ;;  %v46_v25 = vsub.f32 %v24_v12, %v193_v11  ;;  %v47_v26 = vsub.f32 %v25_v13, %v193_v11  ;;  %v48_v27 = vsub.f32 %v26_v14, %v193_v11  ;;  %v36_v29 = vld [vmem:[%s284_s0 + $0x68] sm:$0xff] }
   0xc   :  { %v49_v28 = vsub.f32 %v27_v15, %v193_v11  ;;  %v37_v30 = vld [vmem:[%s284_s0 + $0x70] sm:$0xff]  ;;  %v38_v31 = vld [vmem:[%s284_s0 + $0x78] sm:$0xff]  ;;  %v50_v33 = vsub.f32 %v28_v16, %v193_v11  ;;  %v51_v34 = vsub.f32 %v29_v17, %v193_v11  ;;  %v52_v35 = vsub.f32 %v30_v18, %v193_v11  ;;  %s161_s0 = smov [#allocation2]  }
   0xd   :  { %v53_v36 = vsub.f32 %v31_v19, %v193_v11  ;;  %v54_v38 = vsub.f32 %v32_v20, %v193_v11  ;;  %v55_v39 = vsub.f32 %v33_v22, %v193_v11  ;;  %v56_v40 = vsub.f32 %v34_v23, %v193_v11  ;;  %s121_s18 = sshll.u32 %s161_s0, 4  ;;  %s122_s18 = int_to_ptr.vmem [resolvable:$true] %s121_s18 }
   0xe   :  { %v57_v41 = vsub.f32 %v35_v24, %v193_v11  ;;  %v58_v42 = vsub.f32 %v36_v29, %v193_v11  ;;  %v59_v43 = vsub.f32 %v37_v30, %v193_v11  ;;  %v60_v44 = vsub.f32 %v38_v31, %v193_v11  ;;  %s137_s2 = scalar_lea.vmem %s122_s18, 2048  ;;  %p142_p1 = scmp.lt.s32.totalorder %s122_s18, %s122_s18 }
   0xf   :  { %p138_p0 = scmp.ne.s32.totalorder %s122_s18, %s137_s2  ;;  %p143_p2 = scmp.lt.s32.totalorder %s137_s2, %s137_s2 }
  0x11   :  { %p144_p3 = por %p143_p2, %p142_p1 }
  0x13   :  { %p145_p4 = pnand %p144_p3, %p138_p0 }
  0x14   :  { %v136_v32 = vpop.eup %135 }
  0x15   :  { %v65_v37 = vrot.slane %v136_v32, %v42_v9 }
  0x17   :  { %v67_v45 = vmul.f32 %v65_v37, %v45_v21  ;;  %v68_v46 = vmul.f32 %v65_v37, %v46_v25  ;;  %v69_v47 = vmul.f32 %v65_v37, %v47_v26  ;;  %v70_v48 = vmul.f32 %v65_v37, %v48_v27 }
  0x18   :  { %v71_v49 = vmul.f32 %v65_v37, %v49_v28  ;;  %v72_v50 = vmul.f32 %v65_v37, %v50_v33  ;;  %v73_v51 = vmul.f32 %v65_v37, %v51_v34  ;;  %v74_v52 = vmul.f32 %v65_v37, %v52_v35 }
  0x19   :  { %v83_v53 = vmax.f32 %v67_v45, 0.0  ;;  %v84_v54 = vmax.f32 %v68_v46, 0.0  ;;  %v85_v55 = vmax.f32 %v69_v47, 0.0  ;;  %v86_v56 = vmax.f32 %v70_v48, 0.0 }
  0x1a   :  { %v87_v57 = vmax.f32 %v71_v49, 0.0  ;;  %v88_v58 = vmax.f32 %v72_v50, 0.0  ;;  %v89_v59 = vmax.f32 %v73_v51, 0.0  ;;  %v90_v60 = vmax.f32 %v74_v52, 0.0 }
  0x1b   :  { %100 = vst.msk [vmem:[#allocation2] sm:$0xff] %vm99_vm0, %v83_v53  ;;  %101 = vst.msk [vmem:[#allocation2 + $0x8] sm:$0xff] %vm99_vm0, %v84_v54  ;;  %v75_v61 = vmul.f32 %v65_v37, %v53_v36  ;;  %v76_v62 = vmul.f32 %v65_v37, %v54_v38  ;;  %v77_v63 = vmul.f32 %v65_v37, %v55_v39 }
  0x1c   :  { %102 = vst.msk [vmem:[#allocation2 + $0x10] sm:$0xff] %vm99_vm0, %v85_v55  ;;  %103 = vst.msk [vmem:[#allocation2 + $0x18] sm:$0xff] %vm99_vm0, %v86_v56  ;;  %v78_v0 = vmul.f32 %v65_v37, %v56_v40  ;;  %v79_v1 = vmul.f32 %v65_v37, %v57_v41  ;;  %v80_v2 = vmul.f32 %v65_v37, %v58_v42 }
  0x1d   :  { %104 = vst.msk [vmem:[#allocation2 + $0x20] sm:$0xff] %vm99_vm0, %v87_v57  ;;  %105 = vst.msk [vmem:[#allocation2 + $0x28] sm:$0xff] %vm99_vm0, %v88_v58  ;;  %v81_v3 = vmul.f32 %v65_v37, %v59_v43  ;;  %v82_v4 = vmul.f32 %v65_v37, %v60_v44  ;;  %v91_v5 = vmax.f32 %v75_v61, 0.0  ;;  %v92_v6 = vmax.f32 %v76_v62, 0.0 }
  0x1e   :  { %106 = vst.msk [vmem:[#allocation2 + $0x30] sm:$0xff] %vm99_vm0, %v89_v59  ;;  %107 = vst.msk [vmem:[#allocation2 + $0x38] sm:$0xff] %vm99_vm0, %v90_v60  ;;  %v93_v7 = vmax.f32 %v77_v63, 0.0  ;;  %v94_v8 = vmax.f32 %v78_v0, 0.0  ;;  %v95_v9 = vmax.f32 %v79_v1, 0.0  ;;  %v96_v10 = vmax.f32 %v80_v2, 0.0 }
  0x1f   :  { %v97_v11 = vmax.f32 %v81_v3, 0.0  ;;  %v98_v12 = vmax.f32 %v82_v4, 0.0  ;;  %108 = vst.msk [vmem:[#allocation2 + $0x40] sm:$0xff] %vm99_vm0, %v91_v5  ;;  %109 = vst.msk [vmem:[#allocation2 + $0x48] sm:$0xff] %vm99_vm0, %v92_v6 }
  0x20   :  { %110 = vst.msk [vmem:[#allocation2 + $0x50] sm:$0xff] %vm99_vm0, %v93_v7  ;;  %111 = vst.msk [vmem:[#allocation2 + $0x58] sm:$0xff] %vm99_vm0, %v94_v8 }
  0x21   :  { %112 = vst.msk [vmem:[#allocation2 + $0x60] sm:$0xff] %vm99_vm0, %v95_v9  ;;  %113 = vst.msk [vmem:[#allocation2 + $0x68] sm:$0xff] %vm99_vm0, %v96_v10 }
  0x22   :  { %114 = vst.msk [vmem:[#allocation2 + $0x70] sm:$0xff] %vm99_vm0, %v97_v11  ;;  %115 = vst.msk [vmem:[#allocation2 + $0x78] sm:$0xff] %vm99_vm0, %v98_v12 }
  0x23   :  { %148 = shalt.err (!%p145_p4)
}
  0x24   :  { %s149_s21 = scalar_lea.hbm %s287_s3, 2048 }
  0x25   :  { %p150_p5 = scmp.ne.s32.totalorder %s287_s3, %s149_s21  ;;  %p153_p6 = scmp.lt.u32.totalorder %s149_s21, %s287_s3 }
  0x27   :  { %p155_p7 = pnand %p153_p6, %p150_p5 }
  0x29   :  { %158 = shalt.err (!%p155_p7)
}
  0x2a   :  { %s162_s26 = smov 128   ;;  %s163_s27 = smov 8  }
  0x2b   :  { %127 = dma.vmem_to_hbm [thread:$0]  %s122_s18, 2048, %s287_s3, [#allocation3], %s162_s26, %s162_s26, %s163_s27  }
  0x2c   :  { %159 = dma.done.wait [#allocation3], 2048  }
  0x2d   :  { %160 = vsyncadd [#allocation3], 4294965248 }
  0x2e   :  { %131 = vsyncpa [#allocation3], 1 }

// kernel: cnn_attention_forward.4
= control target key start
LH: loop header
LB: loop body
LE: loop exit
PB: predicated region body
PF: predicated region fallthrough
CT: control target
= control target key end

     0   :  { %vm45_vm0 = vcmask 523264   ;;  %vm18_vm1 = vcmask 253952   ;;  %v470_v28 = vmov 0.0   ;;  %vm239_vm2 = vcmask 261120   ;;  %s714_s1 = inlined_call_operand.vmem [shape: f32[64,32], index: 1, kind: input, shape index: {}]   ;;  %s715_s0 = inlined_call_operand.vmem [shape: f32[128,64], index: 0, kind: input, shape index: {}]   ;;  %s716_s3 = inlined_call_operand.vmem [shape: f32[1,32], index: 3, kind: output, shape index: {1}]   ;;  %s717_s4 = inlined_call_operand.vmem [shape: f32[1,32], index: 4, kind: output, shape index: {2}]   ;;  %s718_s2 = inlined_call_operand.vmem [shape: f32[128,32], index: 2, kind: output, shape index: {0}]  }
   0x1   :  { %v37_v0 = vld [vmem:[%s714_s1] sm:$0xff]  ;;  %v38_v1 = vld [vmem:[%s714_s1 + $0x8] sm:$0xff]  ;;  %v39_v2 = vld [vmem:[%s714_s1 + $0x10] sm:$0xff]  ;;  %19 = vst.msk [vmem:[%s716_s3] sm:$0x1] %vm18_vm1, %v470_v28 }
   0x2   :  { %v445_v3 = vpack.c.bf16 %v38_v1, %v37_v0  ;;  %v40_v4 = vld [vmem:[%s714_s1 + $0x18] sm:$0xff]  ;;  %v41_v6 = vld [vmem:[%s714_s1 + $0x20] sm:$0xff]  ;;  %v42_v7 = vld [vmem:[%s714_s1 + $0x28] sm:$0xff]  ;;  %20 = vst.msk [vmem:[%s717_s4] sm:$0x1] %vm18_vm1, %v470_v28 }
   0x3   :  { %v449_v5 = vpack.c.bf16 %v40_v4, %v39_v2  ;;  %v21_v8 = vld [vmem:[%s715_s0] sm:$0xff]  ;;  %v453_v9 = vpack.c.bf16 %v42_v7, %v41_v6  ;;  %v43_v11 = vld [vmem:[%s714_s1 + $0x30] sm:$0xff]  ;;  %v44_v12 = vld [vmem:[%s714_s1 + $0x38] sm:$0xff] }
   0x4   :  { %446 = vmatprep.subr.bf16.mxu0 %v445_v3  ;;  %461 = vmatprep.subr.bf16.mxu1 %v445_v3  ;;  %v29_v10 = vld [vmem:[%s715_s0 + $0x40] sm:$0xff]  ;;  %v457_v13 = vpack.c.bf16 %v44_v12, %v43_v11  ;;  %v22_v14 = vld [vmem:[%s715_s0 + $0x8] sm:$0xff]  ;;  %v23_v15 = vld [vmem:[%s715_s0 + $0x10] sm:$0xff] }
   0x5   :  { %448 = vmatpush3.bf16.msra.mxu0 %v445_v3  ;;  %421 = vmatprep.mubr.msk.f32.mxu0 %vm45_vm0, %v21_v8  ;;  %v30_v16 = vld [vmem:[%s715_s0 + $0x48] sm:$0xff]  ;;  %v31_v17 = vld [vmem:[%s715_s0 + $0x50] sm:$0xff]  ;;  %v24_v18 = vld [vmem:[%s715_s0 + $0x18] sm:$0xff] }
   0x6   :  { %450 = vmatprep.subr.bf16.mxu0 %v449_v5  ;;  %465 = vmatpush3.bf16.msra.mxu1 %v445_v3  ;;  %v25_v19 = vld [vmem:[%s715_s0 + $0x20] sm:$0xff]  ;;  %v32_v20 = vld [vmem:[%s715_s0 + $0x58] sm:$0xff]  ;;  %v26_v22 = vld [vmem:[%s715_s0 + $0x28] sm:$0xff] }
   0x7   :  { %462 = vmatprep.subr.bf16.mxu1 %v449_v5  ;;  %433 = vmatprep.mubr.msk.f32.mxu1 %vm45_vm0, %v29_v10  ;;  %v33_v21 = vld [vmem:[%s715_s0 + $0x60] sm:$0xff]  ;;  %v27_v23 = vld [vmem:[%s715_s0 + $0x30] sm:$0xff]  ;;  %v34_v24 = vld [vmem:[%s715_s0 + $0x68] sm:$0xff] }
   0x8   :  { %v35_v25 = vld [vmem:[%s715_s0 + $0x70] sm:$0xff]  ;;  %v28_v26 = vld [vmem:[%s715_s0 + $0x38] sm:$0xff] }
   0x9   :  { %452 = vmatpush3.bf16.msra.mxu0 %v449_v5  ;;  %v36_v27 = vld [vmem:[%s715_s0 + $0x78] sm:$0xff] }
   0xa   :  { %454 = vmatprep.subr.bf16.mxu0 %v453_v9  ;;  %466 = vmatpush3.bf16.msra.mxu1 %v449_v5 }
   0xb   :  { %463 = vmatprep.subr.bf16.mxu1 %v453_v9 }
   0xd   :  { %456 = vmatpush3.bf16.msra.mxu0 %v453_v9 }
   0xe   :  { %458 = vmatprep.subr.bf16.mxu0 %v457_v13  ;;  %467 = vmatpush3.bf16.msra.mxu1 %v453_v9 }
   0xf   :  { %464 = vmatprep.subr.bf16.mxu1 %v457_v13 }
  0x11   :  { %460 = vmatpush3.bf16.msra.mxu0 %v457_v13 }
  0x12   :  { %468 = vmatpush3.bf16.msra.mxu1 %v457_v13 }
  0x14   :  { %422 = vmatmul.mubr.msk.f32.vlgmr.msra.gmra.mrb[0].mxu0 %vm45_vm0, %v22_v14 }
  0x15   :  { %424 = vmatprep.mubr.msk.f32.mxu0 %vm45_vm0, %v23_v15  ;;  %434 = vmatmul.mubr.msk.f32.vlgmr.msra.gmra.mrb[0].mxu1 %vm45_vm0, %v30_v16 }
  0x16   :  { %436 = vmatprep.mubr.msk.f32.mxu1 %vm45_vm0, %v31_v17 }
  0x18   :  { %425 = vmatmul.mubr.msk.f32.gmra.mrb[2].mxu0 %vm45_vm0, %v24_v18 }
  0x19   :  { %427 = vmatprep.mubr.msk.f32.mxu0 %vm45_vm0, %v25_v19  ;;  %437 = vmatmul.mubr.msk.f32.gmra.mrb[2].mxu1 %vm45_vm0, %v32_v20 }
  0x1a   :  { %439 = vmatprep.mubr.msk.f32.mxu1 %vm45_vm0, %v33_v21 }
  0x1c   :  { %428 = vmatmul.mubr.msk.f32.gmra.mrb[4].mxu0 %vm45_vm0, %v26_v22 }
  0x1d   :  { %430 = vmatprep.mubr.msk.f32.mxu0 %vm45_vm0, %v27_v23  ;;  %440 = vmatmul.mubr.msk.f32.gmra.mrb[4].mxu1 %vm45_vm0, %v34_v24 }
  0x1e   :  { %442 = vmatprep.mubr.msk.f32.mxu1 %vm45_vm0, %v35_v25 }
  0x20   :  { %431 = vmatmul.mubr.msk.f32.gmra.mrb[6].mxu0 %vm45_vm0, %v28_v26 }
  0x21   :  { %443 = vmatmul.mubr.msk.f32.gmra.mrb[6].mxu1 %vm45_vm0, %v36_v27 }
  0xe7   :  { %v423_v29 = vpop.f32.mrb[0].mxu0 }
  0xe8   :  { %241 = vst.msk [vmem:[%s718_s2 + $0x8] sm:$0xff] %vm239_vm2, %v423_v29  ;;  %v258_v30 = vsel %vm239_vm2, %v423_v29, 0.0  ;;  %v299_v31 = vmul.f32 %v423_v29, %v423_v29  ;;  %v160_v32 = vpop.f32.mrb[1].mxu0  ;;  %v597_v33 = vpop.f32.mrb[0].mxu1 }
  0xe9   :  { %240 = vst.msk [vmem:[%s718_s2] sm:$0xff] %vm239_vm2, %v160_v32  ;;  %v257_v34 = vsel %vm239_vm2, %v160_v32, 0.0  ;;  %v298_v35 = vmul.f32 %v160_v32, %v160_v32  ;;  %249 = vst.msk [vmem:[%s718_s2 + $0x48] sm:$0xff] %vm239_vm2, %v597_v33  ;;  %v200_v36 = vpop.f32.mrb[1].mxu1  ;;  %v307_v20 = vmul.f32 %v597_v33, %v597_v33  ;;  %v274_v25 = vsel %vm239_vm2, %v597_v33, 0.0 }
  0xea   :  { %v315_v37 = vsel %vm239_vm2, %v299_v31, 0.0  ;;  %v259_v38 = vadd.f32 %v258_v30, %v257_v34  ;;  %248 = vst.msk [vmem:[%s718_s2 + $0x40] sm:$0xff] %vm239_vm2, %v200_v36  ;;  %v306_v5 = vmul.f32 %v200_v36, %v200_v36  ;;  %v272_v16 = vsel %vm239_vm2, %v200_v36, 0.0 }
  0xeb   :  { %v314_v39 = vsel %vm239_vm2, %v298_v35, 0.0  ;;  %v426_v40 = vpop.f32.mrb[2].mxu0  ;;  %v331_v29 = vsel %vm239_vm2, %v307_v20, 0.0 }
  0xec   :  { %v316_v41 = vadd.f32 %v315_v37, %v314_v39  ;;  %243 = vst.msk [vmem:[%s718_s2 + $0x18] sm:$0xff] %vm239_vm2, %v426_v40  ;;  %v170_v42 = vpop.f32.mrb[3].mxu0  ;;  %v619_v43 = vpop.f32.mrb[2].mxu1  ;;  %v301_v44 = vmul.f32 %v426_v40, %v426_v40  ;;  %v262_v49 = vsel %vm239_vm2, %v426_v40, 0.0  ;;  %v329_v21 = vsel %vm239_vm2, %v306_v5, 0.0 }
  0xed   :  { %242 = vst.msk [vmem:[%s718_s2 + $0x10] sm:$0xff] %vm239_vm2, %v170_v42  ;;  %v260_v45 = vsel %vm239_vm2, %v170_v42, 0.0  ;;  %v300_v46 = vmul.f32 %v170_v42, %v170_v42  ;;  %251 = vst.msk [vmem:[%s718_s2 + $0x58] sm:$0xff] %vm239_vm2, %v619_v43  ;;  %v210_v47 = vpop.f32.mrb[3].mxu1  ;;  %v309_v30 = vmul.f32 %v619_v43, %v619_v43  ;;  %v278_v36 = vsel %vm239_vm2, %v619_v43, 0.0 }
  0xee   :  { %v261_v48 = vadd.f32 %v260_v45, %v259_v38  ;;  %250 = vst.msk [vmem:[%s718_s2 + $0x50] sm:$0xff] %vm239_vm2, %v210_v47  ;;  %v319_v56 = vsel %vm239_vm2, %v301_v44, 0.0  ;;  %v308_v22 = vmul.f32 %v210_v47, %v210_v47  ;;  %v276_v26 = vsel %vm239_vm2, %v210_v47, 0.0 }
  0xef   :  { %v317_v50 = vsel %vm239_vm2, %v300_v46, 0.0  ;;  %v429_v51 = vpop.f32.mrb[4].mxu0  ;;  %v335_v39 = vsel %vm239_vm2, %v309_v30, 0.0 }
  0xf0   :  { %v318_v52 = vadd.f32 %v317_v50, %v316_v41  ;;  %245 = vst.msk [vmem:[%s718_s2 + $0x28] sm:$0xff] %vm239_vm2, %v429_v51  ;;  %v180_v53 = vpop.f32.mrb[5].mxu0  ;;  %v263_v54 = vadd.f32 %v262_v49, %v261_v48  ;;  %v441_v55 = vpop.f32.mrb[4].mxu1  ;;  %v303_v57 = vmul.f32 %v429_v51, %v429_v51  ;;  %v266_v63 = vsel %vm239_vm2, %v429_v51, 0.0 }
  0xf1   :  { %244 = vst.msk [vmem:[%s718_s2 + $0x20] sm:$0xff] %vm239_vm2, %v180_v53  ;;  %v264_v58 = vsel %vm239_vm2, %v180_v53, 0.0  ;;  %v302_v59 = vmul.f32 %v180_v53, %v180_v53  ;;  %253 = vst.msk [vmem:[%s718_s2 + $0x68] sm:$0xff] %vm239_vm2, %v441_v55  ;;  %v220_v60 = vpop.f32.mrb[5].mxu1  ;;  %v333_v31 = vsel %vm239_vm2, %v308_v22, 0.0  ;;  %v311_v40 = vmul.f32 %v441_v55, %v441_v55 }
  0xf2   :  { %v265_v61 = vadd.f32 %v264_v58, %v263_v54  ;;  %v320_v62 = vadd.f32 %v319_v56, %v318_v52  ;;  %252 = vst.msk [vmem:[%s718_s2 + $0x60] sm:$0xff] %vm239_vm2, %v220_v60  ;;  %v323_v7 = vsel %vm239_vm2, %v303_v57, 0.0  ;;  %v310_v32 = vmul.f32 %v220_v60, %v220_v60 }
  0xf3   :  { %v321_v0 = vsel %vm239_vm2, %v302_v59, 0.0  ;;  %v432_v1 = vpop.f32.mrb[6].mxu0  ;;  %v280_v37 = vsel %vm239_vm2, %v220_v60, 0.0  ;;  %v282_v46 = vsel %vm239_vm2, %v441_v55, 0.0  ;;  %v339_v43 = vsel %vm239_vm2, %v311_v40, 0.0 }
  0xf4   :  { %v322_v2 = vadd.f32 %v321_v0, %v320_v62  ;;  %247 = vst.msk [vmem:[%s718_s2 + $0x38] sm:$0xff] %vm239_vm2, %v432_v1  ;;  %v190_v3 = vpop.f32.mrb[7].mxu0  ;;  %v267_v4 = vadd.f32 %v266_v63, %v265_v61  ;;  %v444_v6 = vpop.f32.mrb[6].mxu1  ;;  %v305_v8 = vmul.f32 %v432_v1, %v432_v1  ;;  %v270_v14 = vsel %vm239_vm2, %v432_v1, 0.0 }
  0xf5   :  { %246 = vst.msk [vmem:[%s718_s2 + $0x30] sm:$0xff] %vm239_vm2, %v190_v3  ;;  %v268_v9 = vsel %vm239_vm2, %v190_v3, 0.0  ;;  %v304_v10 = vmul.f32 %v190_v3, %v190_v3  ;;  %255 = vst.msk [vmem:[%s718_s2 + $0x78] sm:$0xff] %vm239_vm2, %v444_v6  ;;  %v230_v11 = vpop.f32.mrb[7].mxu1  ;;  %v337_v41 = vsel %vm239_vm2, %v310_v32, 0.0  ;;  %v313_v50 = vmul.f32 %v444_v6, %v444_v6 }
  0xf6   :  { %v269_v12 = vadd.f32 %v268_v9, %v267_v4  ;;  %v324_v13 = vadd.f32 %v323_v7, %v322_v2  ;;  %254 = vst.msk [vmem:[%s718_s2 + $0x70] sm:$0xff] %vm239_vm2, %v230_v11  ;;  %v327_v19 = vsel %vm239_vm2, %v305_v8, 0.0  ;;  %v312_v42 = vmul.f32 %v230_v11, %v230_v11  ;;  %v256_v4 = vld [vmem:[%s716_s3] sm:$0x1] }
  0xf7   :  { %v325_v15 = vsel %vm239_vm2, %v304_v10, 0.0  ;;  %v284_v47 = vsel %vm239_vm2, %v230_v11, 0.0  ;;  %v286_v54 = vsel %vm239_vm2, %v444_v6, 0.0  ;;  %v343_v58 = vsel %vm239_vm2, %v313_v50, 0.0  ;;  %v297_v7 = vld [vmem:[%s717_s4] sm:$0x1] }
  0xf8   :  { %v271_v17 = vadd.f32 %v270_v14, %v269_v12  ;;  %v326_v18 = vadd.f32 %v325_v15, %v324_v13  ;;  %v341_v51 = vsel %vm239_vm2, %v312_v42, 0.0 }
  0xfa   :  { %v328_v23 = vadd.f32 %v327_v19, %v326_v18  ;;  %v273_v24 = vadd.f32 %v272_v16, %v271_v17 }
  0xfc   :  { %v330_v27 = vadd.f32 %v329_v21, %v328_v23  ;;  %v275_v28 = vadd.f32 %v274_v25, %v273_v24 }
  0xfe   :  { %v277_v34 = vadd.f32 %v276_v26, %v275_v28  ;;  %v332_v35 = vadd.f32 %v331_v29, %v330_v27 }
 0x100   :  { %v334_v33 = vadd.f32 %v333_v31, %v332_v35  ;;  %v279_v38 = vadd.f32 %v278_v36, %v277_v34 }
 0x102   :  { %v281_v44 = vadd.f32 %v280_v37, %v279_v38  ;;  %v336_v45 = vadd.f32 %v335_v39, %v334_v33 }
 0x104   :  { %v338_v48 = vadd.f32 %v337_v41, %v336_v45  ;;  %v283_v49 = vadd.f32 %v282_v46, %v281_v44 }
 0x106   :  { %v285_v52 = vadd.f32 %v284_v47, %v283_v49  ;;  %v340_v53 = vadd.f32 %v339_v43, %v338_v48 }
 0x108   :  { %v287_v56 = vadd.f32 %v286_v54, %v285_v52  ;;  %v342_v57 = vadd.f32 %v341_v51, %v340_v53 }
 0x10a   :  { %v288_v59 = vrot.slane %v287_v56, 4  ;;  %v344_v60 = vadd.f32 %v343_v58, %v342_v57 }
 0x10c   :  { %v289_v55 = vadd.f32 %v288_v59, %v287_v56  ;;  %v345_v61 = vrot.slane %v344_v60, 4 }
 0x10e   :  { %v290_v62 = vrot.slane %v289_v55, 2  ;;  %v346_v63 = vadd.f32 %v345_v61, %v344_v60 }
 0x110   :  { %v291_v0 = vadd.f32 %v290_v62, %v289_v55  ;;  %v347_v1 = vrot.slane %v346_v63, 2 }
 0x112   :  { %v292_v2 = vrot.slane %v291_v0, 1  ;;  %v348_v3 = vadd.f32 %v347_v1, %v346_v63 }
 0x114   :  { %v293_v5 = vadd.f32 %v292_v2, %v291_v0  ;;  %v349_v6 = vrot.slane %v348_v3, 1 }
 0x116   :  { %v294_v8 = vadd.f32 %v293_v5, %v256_v4  ;;  %v350_v9 = vadd.f32 %v349_v6, %v348_v3 }
 0x118   :  { %296 = vst.msk [vmem:[%s716_s3] sm:$0x1] %vm18_vm1, %v294_v8  ;;  %v351_v10 = vadd.f32 %v350_v9, %v297_v7 }
 0x11a   :  { %352 = vst.msk [vmem:[%s717_s4] sm:$0x1] %vm18_vm1, %v351_v10 }

// kernel: cnn_attention_forward.3
= control target key start
LH: loop header
LB: loop body
LE: loop exit
PB: predicated region body
PF: predicated region fallthrough
CT: control target
= control target key end

     0   :  { %s1646_s9 = smov 0   ;;  %s2152_s0 = inlined_call_operand.vmem [shape: bf16[2,64,32], index: 0, kind: input, shape index: {}]   ;;  %s2153_s1 = inlined_call_operand.vmem [shape: bf16[32,192], index: 1, kind: input, shape index: {}]   ;;  %s2154_s2 = inlined_call_operand.vmem [shape: f32[2,64,64], index: 2, kind: output, shape index: {}]  }
   0x1 LB: > { %s1355_s10 = sadd.s32 4294967295, %s1625_s9   ;;  %p1359_p0 = scmp.ge.s32.totalorder %s1625_s9, 1  ;;  %s1625_s9 = sphi %s1646_s9, %s12_s9  }
   0x2   : > { %p112_p1 = scmp.lt.s32.totalorder %s1625_s9, 3 }
   0x4   : > { %p113_p2 = pnand %p1359_p0, %p112_p1 }
   0x5   : > { %v1513_v0 = vld [vmem:[%s2153_s1 + $0x4] ss:$8 sps:$4 sm:$0xff] (!%p113_p2)   ;;  %p134_p3 = scmp.lt.s32.totalorder (!%p113_p2), %s1355_s10, 1  ;;  %v1515_v1 = vld [vmem:[%s2153_s1] ss:$8 sps:$4 sm:$0xff] (!%p113_p2)   ;;  %v1627_v2 = vmov (!%p113_p2), 0  }
   0x6   : > { %116 = sbr.rel (%p113_p2) target bundleno = 1231 (0x4cf), region = 28  ;;  %242 = vmatprep.mubr.bf16.mxu0 (!%p113_p2), %v1627_v2  ;;  %210 = vmatprep.subr.bf16.mxu0 (!%p113_p2), %v1513_v0  ;;  %v1516_v3 = vld [vmem:[%s2153_s1 + $0x14] ss:$8 sps:$4 sm:$0xff] (!%p113_p2)   ;;  %v1518_v4 = vld [vmem:[%s2153_s1 + $0x10] ss:$8 sps:$4 sm:$0xff] (!%p113_p2)   ;;  %vm197_vm0 = vcmask (!%p113_p2), 261120  }
   0x7   : > { %211 = vmatpush1.bf16.msra.mxu0 (!%p113_p2), %v1515_v1  ;;  %s1628_s23 = smov (!%p113_p2), 64   ;;  %s1629_s24 = smov (!%p113_p2), 32  }
   0x8   : > { %212 = vmatprep.subr.bf16.mxu0 (!%p113_p2), %v1516_v3  ;;  %s1630_s25 = smov (!%p113_p2), 96  }
   0xb   : > { %213 = vmatpush1.bf16.msra.mxu0 (!%p113_p2), %v1518_v4 }
   0xd   : > { %s2156_s10 = smov (!%p134_p3, %s1355_s10), 1 }
   0xe   : > { %s1394_s19 = sshll.u32 %s2156_s10, 5  ;;  %s1395_s26 = sshll.u32 %s2156_s10, 6 }
   0xf   : > { %s138_s22 = scalar_lea.vmem %s2152_s0, %s1394_s19  ;;  %s143_s29 = scalar_lea.vmem %s2154_s2, %s1395_s26 }
  0x10   : > { %v1519_v5 = vld [vmem:[%s138_s22] sm:$0xff]   ;;  %v1520_v6 = vld [vmem:[%s138_s22 + $0x8] sm:$0xff]   ;;  %v1521_v7 = vld [vmem:[%s138_s22 + $0x10] sm:$0xff]  }
  0x11   : > { %1372 = vmatmul.mubr.msk.bf16.vlgmr.msra.gmra.mrb[0].mxu0 %vm197_vm0, %v1519_v5  ;;  %v1522_v8 = vld [vmem:[%s138_s22 + $0x18] sm:$0xff]  }
  0x12   : > { %252 = vmatprep.mubr.bf16.mxu0 %v1627_v2 }
  0x19   : > { %1373 = vmatmul.mubr.msk.bf16.gmra.mrb[4].mxu0 %vm197_vm0, %v1520_v6 }
  0x1a   : > { %262 = vmatprep.mubr.bf16.mxu0 %v1627_v2 }
  0x21   : > { %1374 = vmatmul.mubr.msk.bf16.gmra.mrb[8].mxu0 %vm197_vm0, %v1521_v7 }
  0x22   : > { %272 = vmatprep.mubr.bf16.mxu0 %v1627_v2 }
  0x29   : > { %1375 = vmatmul.mubr.msk.bf16.gmra.mrb[12].mxu0 %vm197_vm0, %v1522_v8 }
  0xe4   : > { %v244_v9 = vpop.f32.mrb[0].mxu0 }
  0xe5   : > { %v283_v10 = vmul.f32 %v244_v9, %v244_v9  ;;  %v246_v11 = vpop.f32.mrb[1].mxu0 }
  0xe6   : > { %v248_v12 = vpop.f32.mrb[2].mxu0 }
  0xe7   : > { %v531_v13 = vpack.c.bf16 %v248_v12, %v244_v9  ;;  %387 = vrot.lane.b32.xlu0 %v283_v10, %s1628_s23  ;;  %v250_v14 = vpop.f32.mrb[3].mxu0  ;;  %v291_v15 = vsel %vm197_vm0, %v283_v10, 0.0  ;;  %v284_v26 = vmul.f32 %v248_v12, %v248_v12 }
  0xe8   : > { %v1678_v16 = vpack.c.bf16 %v250_v14, %v246_v11  ;;  %292 = vadd.xlane.f32.xlu1 %v291_v15 }
  0xe9   : > { %1436 = vmatprep.mubr.msk.bf16.mxu1 %vm197_vm0, %v531_v13  ;;  %v294_v37 = vsel %vm197_vm0, %v284_v26, 0.0 }
  0xea   : > { %1444 = vmatprep.subr.bf16.mxu0 %v1678_v16 }
  0xeb   : > { %870 = vrot.lane.b32.xlu0 %v283_v10, %s1629_s24  ;;  %1445 = vmatpush3.bf16.msra.mxu0 %v1678_v16 }
  0xec   : > { %v254_v17 = vpop.f32.mrb[4].mxu0 }
  0xed   : > { %v256_v18 = vpop.f32.mrb[5].mxu0  ;;  %v285_v36 = vmul.f32 %v254_v17, %v254_v17 }
  0xee   : > { %v258_v19 = vpop.f32.mrb[6].mxu0 }
  0xef   : > { %758 = vrot.lane.b32.xlu0 %v283_v10, %s1630_s25  ;;  %v1685_v20 = vpack.c.bf16 %v258_v19, %v254_v17  ;;  %v260_v21 = vpop.f32.mrb[7].mxu0  ;;  %v297_v38 = vsel %vm197_vm0, %v285_v36, 0.0  ;;  %v286_v39 = vmul.f32 %v258_v19, %v258_v19 }
  0xf0   : > { %v1687_v22 = vpack.c.bf16 %v260_v21, %v256_v18 }
  0xf1   : > { %v300_v47 = vsel %vm197_vm0, %v286_v39, 0.0 }
  0xf2   : > { %1446 = vmatprep.subr.bf16.mxu0 %v1687_v22 }
  0xf3   : > { %543 = vrot.lane.b32.xlu0 %v531_v13, %s1628_s23  ;;  %1447 = vmatpush3.bf16.msra.mxu0 %v1687_v22 }
  0xf4   : > { %v264_v23 = vpop.f32.mrb[8].mxu0 }
  0xf5   : > { %v266_v24 = vpop.f32.mrb[9].mxu0  ;;  %v287_v40 = vmul.f32 %v264_v23, %v264_v23 }
  0xf6   : > { %v268_v25 = vpop.f32.mrb[10].mxu0 }
  0xf7   : > { %1022 = vrot.lane.b32.xlu0 %v531_v13, %s1629_s24  ;;  %v1693_v27 = vpack.c.bf16 %v268_v25, %v264_v23  ;;  %v270_v28 = vpop.f32.mrb[11].mxu0  ;;  %v288_v41 = vmul.f32 %v268_v25, %v268_v25  ;;  %v303_v48 = vsel %vm197_vm0, %v287_v40, 0.0 }
  0xf8   : > { %v1695_v29 = vpack.c.bf16 %v270_v28, %v266_v24 }
  0xf9   : > { %389 = vrot.lane.b32.xlu1 %v284_v26, %s1628_s23  ;;  %v306_v57 = vsel %vm197_vm0, %v288_v41, 0.0 }
  0xfa   : > { %1448 = vmatprep.subr.bf16.mxu0 %v1695_v29 }
  0xfb   : > { %1014 = vrot.lane.b32.xlu0 %v531_v13, %s1630_s25  ;;  %1449 = vmatpush3.bf16.msra.mxu0 %v1695_v29 }
  0xfc   : > { %v274_v30 = vpop.f32.mrb[12].mxu0 }
  0xfd   : > { %872 = vrot.lane.b32.xlu1 %v284_v26, %s1629_s24  ;;  %v276_v31 = vpop.f32.mrb[13].mxu0  ;;  %v289_v49 = vmul.f32 %v274_v30, %v274_v30 }
  0xfe   : > { %v1702_v32 = vpop.f32.mrb[14].mxu0 }
  0xff   : > { %v1705_v33 = vpack.c.bf16 %v1702_v32, %v274_v30  ;;  %v280_v34 = vpop.f32.mrb[15].mxu0  ;;  %v309_v0 = vsel %vm197_vm0, %v289_v49, 0.0  ;;  %v290_v3 = vmul.f32 %v1702_v32, %v1702_v32 }
 0x100   : > { %v1707_v35 = vpack.c.bf16 %v280_v34, %v276_v31 }
 0x101   : > { %760 = vrot.lane.b32.xlu1 %v284_v26, %s1630_s25  ;;  %v312_v15 = vsel %vm197_vm0, %v290_v3, 0.0 }
 0x102   : > { %1450 = vmatprep.subr.bf16.mxu0 %v1707_v35 }
 0x103   : > { %1451 = vmatpush3.bf16.msra.mxu0 %v1707_v35 }
 0x105   : > { %762 = vrot.lane.b32.xlu1 %v285_v36, %s1630_s25 }
 0x11a   : > { %295 = vadd.xlane.f32.xlu0 %v294_v37 }
 0x129   : > { %298 = vadd.xlane.f32.xlu1 %v297_v38 }
 0x130   : > { %391 = vrot.lane.b32.xlu0 %v285_v36, %s1628_s23 }
 0x134   : > { %874 = vrot.lane.b32.xlu0 %v285_v36, %s1629_s24 }
 0x138   : > { %545 = vrot.lane.b32.xlu0 %v1685_v20, %s1628_s23 }
 0x13a   : > { %1024 = vrot.lane.b32.xlu1 %v1685_v20, %s1629_s24 }
 0x13c   : > { %764 = vrot.lane.b32.xlu0 %v286_v39, %s1630_s25 }
 0x13e   : > { %1016 = vrot.lane.b32.xlu1 %v1685_v20, %s1630_s25 }
 0x140   : > { %395 = vrot.lane.b32.xlu0 %v287_v40, %s1628_s23 }
 0x142   : > { %393 = vrot.lane.b32.xlu1 %v286_v39, %s1628_s23 }
 0x144   : > { %878 = vrot.lane.b32.xlu0 %v287_v40, %s1629_s24 }
 0x146   : > { %876 = vrot.lane.b32.xlu1 %v286_v39, %s1629_s24 }
 0x148   : > { %1026 = vrot.lane.b32.xlu0 %v1693_v27, %s1629_s24 }
 0x14a   : > { %766 = vrot.lane.b32.xlu1 %v287_v40, %s1630_s25 }
 0x14e   : > { %547 = vrot.lane.b32.xlu1 %v1693_v27, %s1628_s23 }
 0x152   : > { %397 = vrot.lane.b32.xlu1 %v288_v41, %s1628_s23 }
 0x156   : > { %880 = vrot.lane.b32.xlu1 %v288_v41, %s1629_s24 }
 0x159   : > { %v1735_v42 = vpop.permute.xlu0 %387 }
 0x15a   : > { %549 = vrot.lane.b32.xlu1 %v1705_v33, %s1628_s23  ;;  %v411_v18 = vsel %vm197_vm0, %v1735_v42, 0.0 }
 0x15d   : > { %v1739_v43 = vpop.permute.xlu0 %870 }
 0x15e   : > { %v894_v25 = vsel %vm197_vm0, %v1739_v43, 0.0 }
 0x161   : > { %v1741_v44 = vpop.permute.xlu0 %758 }
 0x162   : > { %v782_v28 = vsel %vm197_vm0, %v1741_v44, 0.0 }
 0x165   : > { %v544_v45 = vpop.permute.xlu0 %543 }
 0x166   : > { %1492 = vmatprep.subr.msk.bf16.mxu1 %vm197_vm0, %v544_v45  ;;  %v564_v46 = vsel %vm197_vm0, %v544_v45, 0 }
 0x167   : > { %1429 = vmatpush3.bf16.xpose.msra.mxu1 %v564_v46  ;;  %301 = vadd.xlane.f32.xlu0 %v300_v47 }
 0x169   : > { %v1023_v51 = vpop.permute.xlu0 %1022 }
 0x16a   : > { %v1043_v17 = vsel %vm197_vm0, %v1023_v51, 0 }
 0x16d   : > { %v1015_v53 = vpop.permute.xlu0 %1014 }
 0x175   : > { %v1757_v50 = vpop.xlane.xlu1 %292 }
 0x179   : > { %v1759_v52 = vpop.permute.xlu1 %389 }
 0x17a   : > { %v414_v32 = vsel %vm197_vm0, %v1759_v52, 0.0 }
 0x17d   : > { %1018 = vrot.lane.b32.xlu0 %v1693_v27, %s1630_s25  ;;  %v873_v54 = vpop.permute.xlu1 %872 }
 0x17e   : > { %304 = vadd.xlane.f32.xlu1 %v303_v48  ;;  %v897_v21 = vsel %vm197_vm0, %v873_v54, 0.0 }
 0x181   : > { %768 = vrot.lane.b32.xlu0 %v288_v41, %s1630_s25  ;;  %v761_v58 = vpop.permute.xlu1 %760 }
 0x182   : > { %v785_v24 = vsel %vm197_vm0, %v761_v58, 0.0 }
 0x185   : > { %399 = vrot.lane.b32.xlu0 %v289_v49, %s1628_s23  ;;  %v1766_v60 = vpop.permute.xlu1 %762 }
 0x186   : > { %v788_v38 = vsel %vm197_vm0, %v1766_v60, 0.0 }
 0x189   : > { %882 = vrot.lane.b32.xlu0 %v289_v49, %s1629_s24 }
 0x18d   : > { %770 = vrot.lane.b32.xlu0 %v289_v49, %s1630_s25 }
 0x18f   : > { %1028 = vrot.lane.b32.xlu1 %v1705_v33, %s1629_s24 }
 0x193   : > { %1020 = vrot.lane.b32.xlu1 %v1705_v33, %s1630_s25 }
 0x1a7   : > { %v1761_v55 = vpop.xlane.xlu0 %295 }
 0x1ab   : > { %v392_v56 = vpop.permute.xlu0 %391 }
 0x1ac   : > { %307 = vadd.xlane.f32.xlu0 %v306_v57  ;;  %v417_v26 = vsel %vm197_vm0, %v392_v56, 0.0 }
 0x1af   : > { %v1764_v59 = vpop.permute.xlu0 %874 }
 0x1b0   : > { %v900_v36 = vsel %vm197_vm0, %v1764_v59, 0.0 }
 0x1b3   : > { %v546_v61 = vpop.permute.xlu0 %545 }
 0x1b4   : > { %1493 = vmatprep.subr.msk.bf16.mxu1 %vm197_vm0, %v546_v61  ;;  %v567_v62 = vsel %vm197_vm0, %v546_v61, 0 }
 0x1b5   : > { %1431 = vmatpush3.bf16.xpose.msra.mxu1 %v567_v62 }
 0x1b6   : > { %v1770_v63 = vpop.xlane.xlu1 %298 }
 0x1b7   : > { %310 = vadd.xlane.f32.xlu1 %v309_v0  ;;  %v1784_v11 = vpop.permute.xlu0 %764 }
 0x1b8   : > { %v791_v59 = vsel %vm197_vm0, %v1784_v11, 0.0 }
 0x1ba   : > { %v1025_v1 = vpop.permute.xlu1 %1024 }
 0x1bb   : > { %v396_v14 = vpop.permute.xlu0 %395  ;;  %v1046_v23 = vsel %vm197_vm0, %v1025_v1, 0 }
 0x1bc   : > { %v423_v42 = vsel %vm197_vm0, %v396_v14, 0.0 }
 0x1be   : > { %v1773_v2 = vpop.permute.xlu1 %1016 }
 0x1bf   : > { %v879_v19 = vpop.permute.xlu0 %878 }
 0x1c0   : > { %v906_v44 = vsel %vm197_vm0, %v879_v19, 0.0 }
 0x1c2   : > { %v394_v4 = vpop.permute.xlu1 %393  ;;  %772 = vrot.lane.b32.xlu0 %v290_v3, %s1630_s25 }
 0x1c3   : > { %v420_v31 = vsel %vm197_vm0, %v394_v4, 0.0 }
 0x1c6   : > { %v877_v5 = vpop.permute.xlu1 %876 }
 0x1c7   : > { %v903_v41 = vsel %vm197_vm0, %v877_v5, 0.0 }
 0x1c8   : > { %401 = vrot.lane.b32.xlu1 %v290_v3, %s1628_s23 }
 0x1ca   : > { %v1779_v6 = vpop.permute.xlu1 %766 }
 0x1cc   : > { %884 = vrot.lane.b32.xlu1 %v290_v3, %s1629_s24 }
 0x1ce   : > { %v548_v7 = vpop.permute.xlu1 %547 }
 0x1cf   : > { %1494 = vmatprep.subr.msk.bf16.mxu1 %vm197_vm0, %v548_v7  ;;  %v570_v8 = vsel %vm197_vm0, %v548_v7, 0 }
 0x1d0   : > { %1433 = vmatpush3.bf16.xpose.msra.mxu1 %v570_v8 }
 0x1d2   : > { %v398_v9 = vpop.permute.xlu1 %397 }
 0x1d3   : > { %v426_v46 = vsel %vm197_vm0, %v398_v9, 0.0 }
 0x1d6   : > { %v881_v10 = vpop.permute.xlu1 %880 }
 0x1d7   : > { %v909_v34 = vsel %vm197_vm0, %v881_v10, 0.0 }
 0x1da   : > { %v550_v12 = vpop.permute.xlu1 %549 }
 0x1db   : > { %1495 = vmatprep.subr.msk.bf16.mxu1 %vm197_vm0, %v550_v12  ;;  %v573_v13 = vsel %vm197_vm0, %v550_v12, 0 }
 0x1dc   : > { %1435 = vmatpush3.bf16.xpose.msra.mxu1 %v573_v13 }
 0x1dd   : > { %1496 = vmatprep.subr.msk.bf16.mxu1 %vm197_vm0, %v1023_v51  ;;  %v794_v51 = vsel %vm197_vm0, %v1779_v6, 0.0 }
 0x1e1   : > { %313 = vadd.xlane.f32.xlu0 %v312_v15 }
 0x1e3   : > { %1437 = vmatmul.mubr.msk.bf16.vlgmr.msra.gmra.mrb[0].mxu1 %vm197_vm0, %v1685_v20  ;;  %v1027_v20 = vpop.permute.xlu0 %1026 }
 0x1e4   : > { %1440 = vmatprep.mubr.msk.bf16.mxu1 %vm197_vm0, %v1693_v27  ;;  %1461 = vmatpush3.bf16.xpose.msra.mxu1 %v1043_v17  ;;  %v1049_v27 = vsel %vm197_vm0, %v1027_v20, 0 }
 0x1e5   : > { %1497 = vmatprep.subr.msk.bf16.mxu1 %vm197_vm0, %v1025_v1  ;;  %412 = vadd.xlane.f32.xlu0 %v411_v18 }
 0x1e9   : > { %898 = vadd.xlane.f32.xlu0 %v897_v21 }
 0x1eb   : > { %1441 = vmatmul.mubr.msk.bf16.gmra.mrb[4].mxu1 %vm197_vm0, %v1705_v33 }
 0x1ec   : > { %1463 = vmatpush3.bf16.xpose.msra.mxu1 %v1046_v23  ;;  %1468 = vmatprep.mubr.msk.bf16.mxu1 %vm197_vm0, %v1015_v53 }
 0x1ed   : > { %1498 = vmatprep.subr.msk.bf16.mxu1 %vm197_vm0, %v1027_v20  ;;  %786 = vadd.xlane.f32.xlu0 %v785_v24 }
 0x1f0   : > { %895 = vadd.xlane.f32.xlu1 %v894_v25 }
 0x1f1   : > { %418 = vadd.xlane.f32.xlu0 %v417_v26 }
 0x1f4   : > { %v1811_v30 = vpop.xlane.xlu0 %301  ;;  %1465 = vmatpush3.bf16.xpose.msra.mxu1 %v1049_v27  ;;  %783 = vadd.xlane.f32.xlu1 %v782_v28 }
 0x1f5   : > { %421 = vadd.xlane.f32.xlu0 %v420_v31 }
 0x1f8   : > { %v1019_v33 = vpop.permute.xlu0 %1018  ;;  %415 = vadd.xlane.f32.xlu1 %v414_v32 }
 0x1f9   : > { %910 = vadd.xlane.f32.xlu0 %v909_v34 }
 0x1fc   : > { %v769_v37 = vpop.permute.xlu0 %768  ;;  %901 = vadd.xlane.f32.xlu1 %v900_v36 }
 0x200   : > { %v400_v39 = vpop.permute.xlu0 %399  ;;  %789 = vadd.xlane.f32.xlu1 %v788_v38 }
 0x201   : > { %v429_v40 = vsel %vm197_vm0, %v400_v39, 0.0 }
 0x202   : > { %430 = vadd.xlane.f32.xlu0 %v429_v40 }
 0x204   : > { %904 = vadd.xlane.f32.xlu1 %v903_v41  ;;  %v883_v47 = vpop.permute.xlu0 %882 }
 0x205   : > { %v912_v49 = vsel %vm197_vm0, %v883_v47, 0.0 }
 0x208   : > { %424 = vadd.xlane.f32.xlu1 %v423_v42  ;;  %v771_v52 = vpop.permute.xlu0 %770 }
 0x209   : > { %v800_v53 = vsel %vm197_vm0, %v771_v52, 0.0 }
 0x20b   : > { %v1824_v43 = vpop.xlane.xlu1 %304 }
 0x20c   : > { %907 = vadd.xlane.f32.xlu1 %v906_v44 }
 0x20f   : > { %v1029_v45 = vpop.permute.xlu1 %1028 }
 0x210   : > { %v1052_v48 = vsel %vm197_vm0, %v1029_v45, 0  ;;  %1499 = vmatprep.subr.msk.bf16.mxu1 %vm197_vm0, %v1029_v45  ;;  %427 = vadd.xlane.f32.xlu1 %v426_v46 }
 0x211   : > { %1467 = vmatpush3.bf16.xpose.msra.mxu1 %v1052_v48 }
 0x213   : > { %v1021_v54 = vpop.permute.xlu1 %1020 }
 0x214   : > { %913 = vadd.xlane.f32.xlu1 %v912_v49 }
 0x218   : > { %1469 = vmatmul.mubr.msk.bf16.vlgmr.msra.gmra.mrb[8].mxu1 %vm197_vm0, %v1773_v2  ;;  %795 = vadd.xlane.f32.xlu1 %v794_v51 }
 0x219   : > { %1472 = vmatprep.mubr.msk.bf16.mxu1 %vm197_vm0, %v1019_v33 }
 0x21c   : > { %801 = vadd.xlane.f32.xlu1 %v800_v53 }
 0x220   : > { %1473 = vmatmul.mubr.msk.bf16.gmra.mrb[12].mxu1 %vm197_vm0, %v1021_v54 }
 0x22d   : > { %1163 = vrot.lane.b32.xlu1 %v1678_v16, %s1630_s25 }
 0x231   : > { %1165 = vrot.lane.b32.xlu1 %v1687_v22, %s1630_s25  ;;  %v797_v22 = vsel %vm197_vm0, %v769_v37, 0.0 }
 0x235   : > { %1167 = vrot.lane.b32.xlu1 %v1695_v29, %s1630_s25 }
 0x239   : > { %1169 = vrot.lane.b32.xlu1 %v1707_v35, %s1630_s25  ;;  %v1851_v16 = vpop.xlane.xlu0 %307 }
 0x23d   : > { %v773_v61 = vpop.permute.xlu0 %772 }
 0x23e   : > { %v803_v35 = vsel %vm197_vm0, %v773_v61, 0.0 }
 0x244   : > { %v1846_v56 = vpop.xlane.xlu1 %310 }
 0x248   : > { %v402_v57 = vpop.permute.xlu1 %401 }
 0x249   : > { %v432_v58 = vsel %vm197_vm0, %v402_v57, 0.0 }
 0x24a   : > { %433 = vadd.xlane.f32.xlu0 %v432_v58 }
 0x24c   : > { %v885_v60 = vpop.permute.xlu1 %884 }
 0x24d   : > { %v915_v29 = vsel %vm197_vm0, %v885_v60, 0.0 }
 0x24e   : > { %792 = vadd.xlane.f32.xlu0 %v791_v59 }
 0x252   : > { %798 = vadd.xlane.f32.xlu0 %v797_v22 }
 0x256   : > { %916 = vadd.xlane.f32.xlu0 %v915_v29 }
 0x25a   : > { %804 = vadd.xlane.f32.xlu0 %v803_v35 }
 0x26e   : > { %v1856_v62 = vpop.xlane.xlu0 %313 }
 0x272   : > { %v413_v0 = vpop.xlane.xlu0 %412 }
 0x273   : > { %v435_v1 = vadd.f32 0.0001, %v413_v0 }
 0x275   : > { %1523 = vrsqrt.f32 %v435_v1  ;;  %vm445_vm1 = vcmp.eq.f32.partialorder %v435_v1, inf  ;;  %v448_v14 = vand.u32 2147483648, %v435_v1  ;;  %vm447_vm2 = vcmp.eq.f32.partialorder %v435_v1, 0.0 }
 0x276   : > { %v899_v2 = vpop.xlane.xlu0 %898 }
 0x277   : > { %v919_v3 = vadd.f32 0.0001, %v899_v2 }
 0x279   : > { %1525 = vrsqrt.f32 %v919_v3  ;;  %vm935_vm5 = vcmp.eq.f32.partialorder %v919_v3, inf  ;;  %v938_v36 = vand.u32 2147483648, %v919_v3  ;;  %vm937_vm6 = vcmp.eq.f32.partialorder %v919_v3, 0.0 }
 0x27a   : > { %v1858_v4 = vpop.xlane.xlu0 %786 }
 0x27d   : > { %v896_v5 = vpop.xlane.xlu1 %895 }
 0x27e   : > { %v918_v6 = vadd.f32 0.0001, %v896_v5  ;;  %v419_v7 = vpop.xlane.xlu0 %418 }
 0x27f   : > { %v1524_v8 = vpop.eup %1523  ;;  %v1862_v11 = vadd.f32 0.0001, %v419_v7 }
 0x280   : > { %v444_v9 = vmul.f32 %v1524_v8, %v435_v1  ;;  %1527 = vrsqrt.f32 %v918_v6  ;;  %vm928_vm3 = vcmp.eq.f32.partialorder %v918_v6, inf  ;;  %v931_v27 = vand.u32 2147483648, %v918_v6 }
 0x281   : > { %v1860_v10 = vpop.xlane.xlu1 %783  ;;  %1529 = vrsqrt.f32 %v1862_v11  ;;  %vm930_vm4 = vcmp.eq.f32.partialorder %v918_v6, 0.0  ;;  %vm459_vm9 = vcmp.eq.f32.partialorder %v1862_v11, inf  ;;  %vm461_vm10 = vcmp.eq.f32.partialorder %v1862_v11, 0.0 }
 0x282   : > { %v422_v12 = vpop.xlane.xlu0 %421  ;;  %v446_v13 = vsel %vm445_vm1, %v435_v1, %v444_v9  ;;  %v462_v22 = vand.u32 2147483648, %v1862_v11 }
 0x283   : > { %v1865_v17 = vadd.f32 0.0001, %v422_v12  ;;  %v449_v19 = vsel %vm447_vm2, %v448_v14, %v446_v13  ;;  %v1526_v21 = vpop.eup %1525 }
 0x284   : > { %v934_v26 = vmul.f32 %v1526_v21, %v919_v3 }
 0x285   : > { %v416_v15 = vpop.xlane.xlu1 %415  ;;  %vm466_vm13 = vcmp.eq.f32.partialorder %v1865_v17, inf  ;;  %v469_v5 = vand.u32 2147483648, %v1865_v17  ;;  %vm468_vm14 = vcmp.eq.f32.partialorder %v1865_v17, 0.0 }
 0x286   : > { %v436_v18 = vadd.f32 0.0001, %v416_v15  ;;  %v936_v33 = vsel %vm935_vm5, %v919_v3, %v934_v26  ;;  %v911_v39 = vpop.xlane.xlu0 %910 }
 0x287   : > { %499 = vxpose.xlu0.b32.start [1/8] (short) (narrow) %v449_v19, 8  ;;  %v939_v41 = vsel %vm937_vm6, %v938_v36, %v936_v33  ;;  %v1871_v47 = vadd.f32 0.0001, %v911_v39 }
 0x288   : > { %1531 = vrsqrt.f32 %v436_v18  ;;  %vm452_vm7 = vcmp.eq.f32.partialorder %v436_v18, inf  ;;  %v455_v46 = vand.u32 2147483648, %v436_v18  ;;  %vm454_vm8 = vcmp.eq.f32.partialorder %v436_v18, 0.0 }
 0x289   : > { %v902_v23 = vpop.xlane.xlu1 %901  ;;  %1533 = vrsqrt.f32 %v1865_v17  ;;  %vm963_vm6 = vcmp.eq.f32.partialorder %v1871_v47, inf }
 0x28a   : > { %v1528_v20 = vpop.eup %1527  ;;  %v920_v24 = vadd.f32 0.0001, %v902_v23 }
 0x28b   : > { %v927_v25 = vmul.f32 %v1528_v20, %v918_v6  ;;  %v1530_v34 = vpop.eup %1529 }
 0x28c   : > { %1535 = vrsqrt.f32 %v920_v24  ;;  %v458_v44 = vmul.f32 %v1530_v34, %v1862_v11  ;;  %vm942_vm11 = vcmp.eq.f32.partialorder %v920_v24, inf  ;;  %v945_v60 = vand.u32 2147483648, %v920_v24 }
 0x28d   : > { %v1868_v28 = vpop.xlane.xlu1 %789  ;;  %v929_v31 = vsel %vm928_vm3, %v918_v6, %v927_v25  ;;  %vm944_vm12 = vcmp.eq.f32.partialorder %v920_v24, 0.0 }
 0x28e   : > { %v932_v32 = vsel %vm930_vm4, %v931_v27, %v929_v31  ;;  %v460_v57 = vsel %vm459_vm9, %v1862_v11, %v458_v44  ;;  %v966_v44 = vand.u32 2147483648, %v1871_v47  ;;  %vm965_vm9 = vcmp.eq.f32.partialorder %v1871_v47, 0.0 }
 0x28f   : > { %982 = vxpose.xlu1.b32.start [1/8] (short) (narrow) %v932_v32, 8  ;;  %v431_v54 = vpop.xlane.xlu0 %430  ;;  %v463_v1 = vsel %vm461_vm10, %v462_v22, %v460_v57 }
 0x290   : > { %v1880_v35 = vadd.f32 0.0001, %v431_v54 }
 0x291   : > { %v905_v37 = vpop.xlane.xlu1 %904 }
 0x292   : > { %v1532_v38 = vpop.eup %1531  ;;  %v921_v40 = vadd.f32 0.0001, %v905_v37  ;;  %vm487_vm10 = vcmp.eq.f32.partialorder %v1880_v35, inf  ;;  %v490_v54 = vand.u32 2147483648, %v1880_v35 }
 0x293   : > { %983 = vxpose.xlu1.b32.cont [2/8] (short) (narrow) %v939_v41, 8  ;;  %v451_v42 = vmul.f32 %v1532_v38, %v436_v18  ;;  %v1534_v45 = vpop.eup %1533 }
 0x294   : > { %1537 = vrsqrt.f32 %v921_v40  ;;  %v465_v59 = vmul.f32 %v1534_v45, %v1865_v17  ;;  %vm949_vm15 = vcmp.eq.f32.partialorder %v921_v40, inf  ;;  %v952_v12 = vand.u32 2147483648, %v921_v40 }
 0x295   : > { %v425_v48 = vpop.xlane.xlu1 %424  ;;  %v453_v49 = vsel %vm452_vm7, %v436_v18, %v451_v42  ;;  %vm951_vm1 = vcmp.eq.f32.partialorder %v921_v40, 0.0 }
 0x296   : > { %v1536_v51 = vpop.eup %1535  ;;  %v439_v52 = vadd.f32 0.0001, %v425_v48  ;;  %v456_v53 = vsel %vm454_vm8, %v455_v46, %v453_v49  ;;  %v467_v3 = vsel %vm466_vm13, %v1865_v17, %v465_v59 }
 0x297   : > { %500 = vxpose.xlu0.b32.cont [2/8] (short) (narrow) %v456_v53, 8  ;;  %v941_v58 = vmul.f32 %v1536_v51, %v920_v24  ;;  %v470_v9 = vsel %vm468_vm14, %v469_v5, %v467_v3 }
 0x298   : > { %1539 = vrsqrt.f32 %v439_v52  ;;  %vm473_vm2 = vcmp.eq.f32.partialorder %v439_v52, inf  ;;  %v476_v17 = vand.u32 2147483648, %v439_v52  ;;  %vm475_vm3 = vcmp.eq.f32.partialorder %v439_v52, 0.0 }
 0x299   : > { %1541 = vrsqrt.f32 %v1871_v47  ;;  %v908_v29 = vpop.xlane.xlu1 %907  ;;  %v943_v61 = vsel %vm942_vm11, %v920_v24, %v941_v58 }
 0x29a   : > { %v922_v0 = vadd.f32 0.0001, %v908_v29  ;;  %v946_v2 = vsel %vm944_vm12, %v945_v60, %v943_v61  ;;  %vm489_vm12 = vcmp.eq.f32.partialorder %v1880_v35, 0.0 }
 0x29b   : > { %501 = vxpose.xlu0.b32.cont [3/8] (short) (narrow) %v463_v1, 8  ;;  %984 = vxpose.xlu1.b32.cont [3/8] (short) (narrow) %v946_v2, 8 }
 0x29c   : > { %1543 = vrsqrt.f32 %v922_v0  ;;  %vm956_vm4 = vcmp.eq.f32.partialorder %v922_v0, inf  ;;  %v959_v33 = vand.u32 2147483648, %v922_v0  ;;  %vm958_vm5 = vcmp.eq.f32.partialorder %v922_v0, 0.0 }
 0x29d   : > { %v428_v6 = vpop.xlane.xlu1 %427  ;;  %1545 = vrsqrt.f32 %v1880_v35 }
 0x29e   : > { %v1538_v7 = vpop.eup %1537  ;;  %v440_v8 = vadd.f32 0.0001, %v428_v6 }
 0x29f   : > { %502 = vxpose.xlu0.b32.cont [4/8] (short) (narrow) %v470_v9, 8  ;;  %v948_v11 = vmul.f32 %v1538_v7, %v921_v40 }
 0x2a0   : > { %1547 = vrsqrt.f32 %v440_v8  ;;  %vm480_vm7 = vcmp.eq.f32.partialorder %v440_v8, inf  ;;  %v483_v42 = vand.u32 2147483648, %v440_v8  ;;  %vm482_vm8 = vcmp.eq.f32.partialorder %v440_v8, 0.0 }
 0x2a1   : > { %v914_v13 = vpop.xlane.xlu1 %913  ;;  %v950_v14 = vsel %vm949_vm15, %v921_v40, %v948_v11 }
 0x2a2   : > { %v1540_v15 = vpop.eup %1539  ;;  %v924_v18 = vadd.f32 0.0001, %v914_v13  ;;  %v953_v19 = vsel %vm951_vm1, %v952_v12, %v950_v14 }
 0x2a3   : > { %v1542_v21 = vpop.eup %1541  ;;  %985 = vxpose.xlu1.b32.cont [4/8] (short) (narrow) %v953_v19, 8  ;;  %v472_v23 = vmul.f32 %v1540_v15, %v439_v52 }
 0x2a4   : > { %1549 = vrsqrt.f32 %v924_v18  ;;  %v962_v31 = vmul.f32 %v1542_v21, %v1871_v47  ;;  %vm970_vm11 = vcmp.eq.f32.partialorder %v924_v18, inf  ;;  %v973_v57 = vand.u32 2147483648, %v924_v18 }
 0x2a5   : > { %v1886_v20 = vpop.xlane.xlu1 %795  ;;  %v474_v24 = vsel %vm473_vm2, %v439_v52, %v472_v23  ;;  %vm972_vm13 = vcmp.eq.f32.partialorder %v924_v18, 0.0 }
 0x2a6   : > { %v1544_v25 = vpop.eup %1543  ;;  %v477_v26 = vsel %vm475_vm3, %v476_v17, %v474_v24  ;;  %v964_v40 = vsel %vm963_vm6, %v1871_v47, %v962_v31 }
 0x2a7   : > { %503 = vxpose.xlu0.b32.cont [5/8] (short) (narrow) %v477_v26, 8  ;;  %v955_v27 = vmul.f32 %v1544_v25, %v922_v0  ;;  %v1546_v32 = vpop.eup %1545  ;;  %v967_v51 = vsel %vm965_vm9, %v966_v44, %v964_v40  ;;  %v318_v40 = vadd.f32 0.0001, %v1811_v30  ;;  %v1950_v44 = vadd.f32 0.0001, %v1846_v56 }
 0x2a8   : > { %v486_v41 = vmul.f32 %v1546_v32, %v1880_v35 }
 0x2a9   : > { %v1889_v34 = vpop.xlane.xlu1 %801  ;;  %v957_v36 = vsel %vm956_vm4, %v922_v0, %v955_v27 }
 0x2aa   : > { %v1548_v37 = vpop.eup %1547  ;;  %v960_v38 = vsel %vm958_vm5, %v959_v33, %v957_v36  ;;  %v488_v52 = vsel %vm487_vm10, %v1880_v35, %v486_v41  ;;  %v1944_v41 = vadd.f32 0.0001, %v1824_v43  ;;  %vm348_vm10 = vcmp.eq.f32.partialorder %v318_v40, 0.0 }
 0x2ab   : > { %986 = vxpose.xlu1.b32.cont [5/8] (short) (narrow) %v960_v38, 8  ;;  %v479_v39 = vmul.f32 %v1548_v37, %v440_v8  ;;  %v491_v47 = vsel %vm489_vm12, %v490_v54, %v488_v52  ;;  %v315_v37 = vadd.f32 0.0001, %v1757_v50  ;;  %v316_v38 = vadd.f32 0.0001, %v1761_v55 }
 0x2ac   : > { %v1955_v55 = vadd.f32 0.0001, %v1856_v62  ;;  %vm355_vm12 = vcmp.eq.f32.partialorder %v1944_v41, 0.0 }
 0x2ad   : > { %v1895_v45 = vpop.permute.xlu1 %1163  ;;  %v481_v46 = vsel %vm480_vm7, %v440_v8, %v479_v39  ;;  %v317_v39 = vadd.f32 0.0001, %v1770_v63  ;;  %v1959_v63 = vadd.f32 0.0001, %v1858_v4  ;;  %vm325_vm3 = vcmp.eq.f32.partialorder %v315_v37, inf }
 0x2ae   : > { %v1550_v48 = vpop.eup %1549  ;;  %1476 = vmatprep.subr.bf16.mxu0 %v1895_v45  ;;  %v484_v49 = vsel %vm482_vm8, %v483_v42, %v481_v46  ;;  %v1947_v42 = vadd.f32 0.0001, %v1851_v16  ;;  %v1962_v16 = vadd.f32 0.0001, %v1860_v10  ;;  %v1965_v46 = vadd.f32 0.0001, %v1868_v28 }
 0x2af   : > { %504 = vxpose.xlu0.b32.cont [6/8] (short) (narrow) %v484_v49, 8  ;;  %987 = vxpose.xlu1.b32.cont [6/8] (short) (narrow) %v967_v51, 8  ;;  %v969_v53 = vmul.f32 %v1550_v48, %v924_v18  ;;  %v328_v4 = vand.u32 2147483648, %v315_v37  ;;  %vm327_vm4 = vcmp.eq.f32.partialorder %v315_v37, 0.0  ;;  %v1972_v10 = vadd.f32 0.0001, %v1886_v20 }
 0x2b0   : > { %vm332_vm5 = vcmp.eq.f32.partialorder %v316_v38, inf  ;;  %vm339_vm6 = vcmp.eq.f32.partialorder %v317_v39, inf  ;;  %vm334_vm7 = vcmp.eq.f32.partialorder %v316_v38, 0.0  ;;  %vm346_vm8 = vcmp.eq.f32.partialorder %v318_v40, inf }
 0x2b1   : > { %v971_v58 = vsel %vm970_vm11, %v924_v18, %v969_v53  ;;  %vm341_vm9 = vcmp.eq.f32.partialorder %v317_v39, 0.0  ;;  %v1979_v20 = vadd.f32 0.0001, %v1889_v34  ;;  %vm353_vm11 = vcmp.eq.f32.partialorder %v1944_v41, inf }
 0x2b2   : > { %v974_v59 = vsel %vm972_vm13, %v973_v57, %v971_v58  ;;  %v356_v34 = vand.u32 2147483648, %v1944_v41  ;;  %vm360_vm13 = vcmp.eq.f32.partialorder %v1947_v42, inf }
 0x2b3   : > { %505 = vxpose.xlu0.b32.cont [7/8] (short) (narrow) %v491_v47, 8  ;;  %988 = vxpose.xlu1.b32.cont [7/8] (short) (narrow) %v974_v59, 8  ;;  %v335_v59 = vand.u32 2147483648, %v316_v38 }
 0x2b6   : > { %v1903_v22 = vpop.f32.mrb[0].mxu1 }
 0x2b7   : > { %v1905_v60 = vpop.f32.mrb[1].mxu1 }
 0x2b8   : > { %v1907_v29 = vpop.f32.mrb[2].mxu1 }
 0x2b9   : > { %v1909_v61 = vpop.f32.mrb[3].mxu1 }
 0x2be   : > { %v1911_v0 = vpop.f32.mrb[4].mxu1 }
 0x2bf   : > { %v1913_v1 = vpop.f32.mrb[5].mxu1 }
 0x2c0   : > { %v1915_v2 = vpop.f32.mrb[6].mxu1 }
 0x2c1   : > { %v1917_v35 = vpop.f32.mrb[7].mxu1 }
 0x2d7   : > { %v434_v3 = vpop.xlane.xlu0 %433 }
 0x2d8   : > { %v442_v5 = vadd.f32 0.0001, %v434_v3  ;;  %v342_v3 = vand.u32 2147483648, %v317_v39 }
 0x2da   : > { %1551 = vrsqrt.f32 %v442_v5  ;;  %vm494_vm14 = vcmp.eq.f32.partialorder %v442_v5, inf  ;;  %v497_v13 = vand.u32 2147483648, %v442_v5  ;;  %vm496_vm15 = vcmp.eq.f32.partialorder %v442_v5, 0.0 }
 0x2db   : > { %v1919_v6 = vpop.xlane.xlu0 %792 }
 0x2df   : > { %v1921_v7 = vpop.xlane.xlu0 %798 }
 0x2e3   : > { %v917_v8 = vpop.xlane.xlu0 %916 }
 0x2e4   : > { %v1552_v9 = vpop.eup %1551  ;;  %v925_v11 = vadd.f32 0.0001, %v917_v8  ;;  %v349_v8 = vand.u32 2147483648, %v318_v40 }
 0x2e5   : > { %v493_v12 = vmul.f32 %v1552_v9, %v442_v5 }
 0x2e6   : > { %1553 = vrsqrt.f32 %v925_v11  ;;  %vm977_vm1 = vcmp.eq.f32.partialorder %v925_v11, inf  ;;  %v980_v25 = vand.u32 2147483648, %v925_v11  ;;  %vm979_vm2 = vcmp.eq.f32.partialorder %v925_v11, 0.0 }
 0x2e7   : > { %v495_v14 = vsel %vm494_vm14, %v442_v5, %v493_v12  ;;  %1555 = vrsqrt.f32 %v315_v37  ;;  %vm362_vm14 = vcmp.eq.f32.partialorder %v1947_v42, 0.0 }
 0x2e8   : > { %v498_v15 = vsel %vm496_vm15, %v497_v13, %v495_v14  ;;  %1557 = vrsqrt.f32 %v316_v38  ;;  %vm367_vm15 = vcmp.eq.f32.partialorder %v1950_v44, inf }
 0x2e9   : > { %506 = vxpose.xlu0.b32.end [8/8] (short) (narrow) %v498_v15, 8  ;;  %1559 = vrsqrt.f32 %v317_v39 }
 0x2ea   : > { %1561 = vrsqrt.f32 %v318_v40 }
 0x2eb   : > { %v1923_v18 = vpop.f32.mrb[8].mxu1  ;;  %1563 = vrsqrt.f32 %v1944_v41 }
 0x2ec   : > { %v1925_v19 = vpop.f32.mrb[9].mxu1  ;;  %1565 = vrsqrt.f32 %v1947_v42 }
 0x2ed   : > { %v1927_v21 = vpop.f32.mrb[10].mxu1  ;;  %1567 = vrsqrt.f32 %v1950_v44 }
 0x2ee   : > { %v1929_v23 = vpop.f32.mrb[11].mxu1  ;;  %1569 = vrsqrt.f32 %v1955_v55 }
 0x2ef   : > { %1571 = vrsqrt.f32 %v1959_v63 }
 0x2f0   : > { %v1554_v17 = vpop.eup %1553  ;;  %1573 = vrsqrt.f32 %v1962_v16 }
 0x2f1   : > { %v976_v24 = vmul.f32 %v1554_v17, %v925_v11  ;;  %v1556_v50 = vpop.eup %1555  ;;  %1575 = vrsqrt.f32 %v1965_v46 }
 0x2f2   : > { %v1558_v30 = vpop.eup %1557  ;;  %v324_v43 = vmul.f32 %v1556_v50, %v315_v37  ;;  %1577 = vrsqrt.f32 %v1972_v10  ;;  %v363_v50 = vand.u32 2147483648, %v1947_v42 }
 0x2f3   : > { %v1931_v26 = vpop.f32.mrb[12].mxu1  ;;  %v978_v27 = vsel %vm977_vm1, %v925_v11, %v976_v24  ;;  %v1560_v56 = vpop.eup %1559  ;;  %v331_v49 = vmul.f32 %v1558_v30, %v316_v38  ;;  %v1990_v24 = vadd.f32 0.0001, %v1919_v6  ;;  %1579 = vrsqrt.f32 %v1979_v20 }
 0x2f4   : > { %v1933_v31 = vpop.f32.mrb[13].mxu1  ;;  %v981_v32 = vsel %vm979_vm2, %v980_v25, %v978_v27  ;;  %v1562_v48 = vpop.eup %1561  ;;  %v326_v62 = vsel %vm325_vm3, %v315_v37, %v324_v43  ;;  %v338_v51 = vmul.f32 %v1560_v56, %v317_v39  ;;  %v640_v27 = vlaneseq }
 0x2f5   : > { %v1935_v33 = vpop.f32.mrb[14].mxu1  ;;  %989 = vxpose.xlu1.b32.end [8/8] (short) (narrow) %v981_v32, 8  ;;  %v345_v52 = vmul.f32 %v1562_v48, %v318_v40  ;;  %v1564_v28 = vpop.eup %1563  ;;  %v1974_v53 = vsel %vm327_vm4, %v328_v4, %v326_v62  ;;  %v333_v57 = vsel %vm332_vm5, %v316_v38, %v331_v49  ;;  %v1996_v37 = vadd.f32 0.0001, %v1921_v7 }
 0x2f6   : > { %v1937_v36 = vpop.f32.mrb[15].mxu1  ;;  %v1566_v54 = vpop.eup %1565  ;;  %v340_v58 = vsel %vm339_vm6, %v317_v39, %v338_v51  ;;  %v352_v9 = vmul.f32 %v1564_v28, %v1944_v41  ;;  %v1981_v11 = vsel %vm334_vm7, %v335_v59, %v333_v57  ;;  %1581 = vrsqrt.f32 %v1990_v24 }
 0x2f7   : > { %v1568_v47 = vpop.eup %1567  ;;  %v347_v5 = vsel %vm346_vm8, %v318_v40, %v345_v52  ;;  %v1983_v12 = vsel %vm341_vm9, %v342_v3, %v340_v58  ;;  %v359_v13 = vmul.f32 %v1566_v54, %v1947_v42  ;;  %v805_v25 = vpop.xlane.xlu0 %804  ;;  %v2010_v56 = vshrl.u32 %v640_v27, 7 }
 0x2f8   : > { %v1570_v14 = vpop.eup %1569  ;;  %v1986_v15 = vsel %vm348_vm10, %v349_v8, %v347_v5  ;;  %v366_v17 = vmul.f32 %v1568_v47, %v1950_v44  ;;  %v354_v39 = vsel %vm353_vm11, %v1944_v41, %v352_v9  ;;  %v2005_v30 = vadd.f32 0.0001, %v805_v25  ;;  %v2024_v54 = vpop.permute.xlu1 %1165 }
 0x2f9   : > { %v1572_v32 = vpop.eup %1571  ;;  %v361_v40 = vsel %vm360_vm13, %v1947_v42, %v359_v13  ;;  %v373_v43 = vmul.f32 %v1570_v14, %v1955_v55  ;;  %v370_v48 = vand.u32 2147483648, %v1950_v44  ;;  %1583 = vrsqrt.f32 %v1996_v37 }
 0x2fa   : > { %v1574_v38 = vpop.eup %1573  ;;  %v368_v7 = vsel %vm367_vm15, %v1950_v44, %v366_v17  ;;  %v822_v62 = vmul.f32 %v1572_v32, %v1959_v63  ;;  %v357_v51 = vsel %vm355_vm12, %v356_v34, %v354_v39  ;;  %v364_v4 = vsel %vm362_vm14, %v363_v50, %v361_v40 }
 0x2fb   : > { %v1576_v6 = vpop.eup %1575  ;;  %v815_v49 = vmul.f32 %v1574_v38, %v1962_v16  ;;  %vm369_vm1 = vcmp.eq.f32.partialorder %v1950_v44, 0.0  ;;  %vm374_vm2 = vcmp.eq.f32.partialorder %v1955_v55, inf  ;;  %vm376_vm3 = vcmp.eq.f32.partialorder %v1955_v55, 0.0 }
 0x2fc   : > { %v829_v52 = vmul.f32 %v1576_v6, %v1965_v46  ;;  %v371_v28 = vsel %vm369_vm1, %v370_v48, %v368_v7  ;;  %1585 = vrsqrt.f32 %v2005_v30  ;;  %v1578_v57 = vpop.eup %1577  ;;  %v375_v41 = vsel %vm374_vm2, %v1955_v55, %v373_v43 }
 0x2fd   : > { %vm823_vm4 = vcmp.eq.f32.partialorder %v1959_v63, inf  ;;  %vm816_vm5 = vcmp.eq.f32.partialorder %v1962_v16, inf  ;;  %v642_v42 = vsub.s32 0, %v2010_v56  ;;  %v377_v44 = vand.u32 2147483648, %v1955_v55  ;;  %v1580_v17 = vpop.eup %1579 }
 0x2fe   : > { %v824_v58 = vsel %vm823_vm4, %v1959_v63, %v822_v62  ;;  %v817_v47 = vsel %vm816_vm5, %v1962_v16, %v815_v49  ;;  %vm830_vm6 = vcmp.eq.f32.partialorder %v1965_v46, inf  ;;  %vm825_vm7 = vcmp.eq.f32.partialorder %v1959_v63, 0.0 }
 0x2ff   : > { %v826_v59 = vand.u32 2147483648, %v1959_v63  ;;  %v819_v3 = vand.u32 2147483648, %v1962_v16  ;;  %v831_v5 = vsel %vm830_vm6, %v1965_v46, %v829_v52  ;;  %v378_v8 = vsel %vm376_vm3, %v377_v44, %v375_v41 }
 0x300   : > { %vm818_vm8 = vcmp.eq.f32.partialorder %v1962_v16, 0.0  ;;  %v833_v9 = vand.u32 2147483648, %v1965_v46  ;;  %v843_v13 = vmul.f32 %v1578_v57, %v1972_v10  ;;  %vm832_vm9 = vcmp.eq.f32.partialorder %v1965_v46, 0.0  ;;  %v2052_v16 = vpop.permute.xlu1 %1167  ;;  %v1582_v34 = vpop.eup %1581 }
 0x301   : > { %v2044_v25 = vsel %vm825_vm7, %v826_v59, %v824_v58  ;;  %v820_v27 = vsel %vm818_vm8, %v819_v3, %v817_v47  ;;  %vm844_vm10 = vcmp.eq.f32.partialorder %v1972_v10, inf  ;;  %vm846_vm11 = vcmp.eq.f32.partialorder %v1972_v10, 0.0 }
 0x302   : > { %v834_v32 = vsel %vm832_vm9, %v833_v9, %v831_v5  ;;  %v847_v55 = vand.u32 2147483648, %v1972_v10  ;;  %v845_v50 = vsel %vm844_vm10, %v1972_v10, %v843_v13  ;;  %v857_v7 = vmul.f32 %v1580_v17, %v1979_v20 }
 0x303   : > { %v1584_v40 = vpop.eup %1583  ;;  %vm858_vm12 = vcmp.eq.f32.partialorder %v1979_v20, inf  ;;  %vm860_vm13 = vcmp.eq.f32.partialorder %v1979_v20, 0.0  ;;  %vm837_vm14 = vcmp.eq.f32.partialorder %v1990_v24, inf  ;;  %vm839_vm15 = vcmp.eq.f32.partialorder %v1990_v24, 0.0 }
 0x304   : > { %v850_v44 = vmul.f32 %v1584_v40, %v1996_v37  ;;  %v2068_v58 = vpop.permute.xlu1 %1169  ;;  %vm851_vm1 = vcmp.eq.f32.partialorder %v1996_v37, inf  ;;  %vm853_vm2 = vcmp.eq.f32.partialorder %v1996_v37, 0.0  ;;  %v854_v13 = vand.u32 2147483648, %v1996_v37 }
 0x305   : > { %vm865_vm3 = vcmp.eq.f32.partialorder %v2005_v30, inf  ;;  %vm867_vm4 = vcmp.eq.f32.partialorder %v2005_v30, 0.0  ;;  %vm680_vm5 = vcmask 523264  }
 0x306   : > { %v1586_v41 = vpop.eup %1585  ;;  %v852_v9 = vsel %vm851_vm1, %v1996_v37, %v850_v44 }
 0x307   : > { %v864_v59 = vmul.f32 %v1586_v41, %v2005_v30 }
 0x309   : > { %v866_v17 = vsel %vm865_vm3, %v2005_v30, %v864_v59 }
 0x34d   : > { %v515_v14 = vpop.trf.xlu0 }
 0x34e   : > { %v643_v63 = vrot.slane %v515_v14, %v642_v42 }
 0x350   : > { %v644_v38 = vmul.f32 %v643_v63, %v1974_v53  ;;  %v645_v39 = vmul.f32 %v643_v63, %v1981_v11  ;;  %v646_v6 = vmul.f32 %v643_v63, %v1983_v12  ;;  %v647_v46 = vmul.f32 %v643_v63, %v1986_v15 }
 0x351   : > { %v648_v43 = vmul.f32 %v643_v63, %v357_v51  ;;  %v649_v48 = vmul.f32 %v643_v63, %v364_v4  ;;  %v650_v57 = vmul.f32 %v643_v63, %v371_v28  ;;  %v861_v53 = vand.u32 2147483648, %v1979_v20 }
 0x352   : > { %v652_v62 = vadd.f32 0.0001, %v644_v38  ;;  %v653_v49 = vadd.f32 0.0001, %v645_v39  ;;  %v654_v52 = vadd.f32 0.0001, %v646_v6  ;;  %v651_v12 = vmul.f32 %v643_v63, %v378_v8 }
 0x353   : > { %v655_v11 = vadd.f32 0.0001, %v647_v46  ;;  %v836_v15 = vmul.f32 %v1582_v34, %v1990_v24  ;;  %v656_v51 = vadd.f32 0.0001, %v648_v43  ;;  %v848_v4 = vsel %vm846_vm11, %v847_v55, %v845_v50 }
 0x354   : > { %1587 = vrcp.f32 %v652_v62  ;;  %v859_v28 = vsel %vm858_vm12, %v1979_v20, %v857_v7  ;;  %v657_v47 = vadd.f32 0.0001, %v649_v48  ;;  %v658_v3 = vadd.f32 0.0001, %v650_v57 }
 0x355   : > { %1589 = vrcp.f32 %v653_v49  ;;  %v659_v5 = vadd.f32 0.0001, %v651_v12  ;;  %v838_v10 = vsel %vm837_vm14, %v1990_v24, %v836_v15  ;;  %v840_v8 = vand.u32 2147483648, %v1990_v24 }
 0x356   : > { %1591 = vrcp.f32 %v654_v52  ;;  %v855_v34 = vsel %vm853_vm2, %v854_v13, %v852_v9  ;;  %v868_v38 = vand.u32 2147483648, %v2005_v30  ;;  %v862_v40 = vsel %vm860_vm13, %v861_v53, %v859_v28 }
 0x357   : > { %1593 = vrcp.f32 %v655_v11  ;;  %v841_v55 = vsel %vm839_vm15, %v840_v8, %v838_v10 }
 0x358   : > { %1595 = vrcp.f32 %v656_v51  ;;  %v869_v50 = vsel %vm867_vm4, %v868_v38, %v866_v17 }
 0x359   : > { %v998_v14 = vpop.trf.xlu1  ;;  %1597 = vrcp.f32 %v657_v47 }
 0x35a   : > { %v1122_v63 = vrot.slane %v998_v14, %v642_v42  ;;  %1599 = vrcp.f32 %v658_v3 }
 0x35b   : > { %1601 = vrcp.f32 %v659_v5 }
 0x35c   : > { %v1123_v37 = vmul.f32 %v1122_v63, %v820_v27  ;;  %v1124_v39 = vmul.f32 %v1122_v63, %v2044_v25  ;;  %v1125_v6 = vmul.f32 %v1122_v63, %v834_v32  ;;  %v1126_v46 = vmul.f32 %v1122_v63, %v841_v55 }
 0x35d   : > { %v1127_v7 = vmul.f32 %v1122_v63, %v848_v4  ;;  %v1128_v56 = vmul.f32 %v1122_v63, %v855_v34  ;;  %v1129_v62 = vmul.f32 %v1122_v63, %v862_v40  ;;  %v1130_v27 = vmul.f32 %v1122_v63, %v869_v50 }
 0x35e   : > { %v1588_v42 = vpop.eup %1587  ;;  %v1131_v43 = vadd.f32 0.0001, %v1123_v37  ;;  %v1132_v48 = vadd.f32 0.0001, %v1124_v39  ;;  %v1133_v24 = vadd.f32 0.0001, %v1125_v6 }
 0x35f   : > { %v1590_v49 = vpop.eup %1589  ;;  %v661_v30 = vmul.f32 %v1588_v42, %v1905_v60  ;;  %v1134_v52 = vadd.f32 0.0001, %v1126_v46  ;;  %v1135_v32 = vadd.f32 0.0001, %v1127_v7  ;;  %v1136_v53 = vadd.f32 0.0001, %v1128_v56 }
 0x360   : > { %v1592_v57 = vpop.eup %1591  ;;  %v663_v25 = vmul.f32 %v1590_v49, %v1909_v61  ;;  %1603 = vrcp.f32 %v1131_v43  ;;  %v1137_v44 = vadd.f32 0.0001, %v1129_v62  ;;  %v1138_v4 = vadd.f32 0.0001, %v1130_v27 }
 0x361   : > { %v1594_v20 = vpop.eup %1593  ;;  %v665_v41 = vmul.f32 %v1592_v57, %v1903_v22  ;;  %1605 = vrcp.f32 %v1132_v48 }
 0x362   : > { %v1596_v11 = vpop.eup %1595  ;;  %v676_v12 = vpack.c.bf16 %v663_v25, %v661_v30  ;;  %v667_v15 = vmul.f32 %v1594_v20, %v1907_v29  ;;  %1607 = vrcp.f32 %v1133_v24 }
 0x363   : > { %v1598_v60 = vpop.eup %1597  ;;  %v669_v51 = vmul.f32 %v1596_v11, %v1913_v1  ;;  %1609 = vrcp.f32 %v1134_v52 }
 0x364   : > { %v1600_v61 = vpop.eup %1599  ;;  %1452 = vmatprep.mubr.msk.bf16.mxu0 %vm680_vm5, %v676_v12  ;;  %v677_v28 = vpack.c.bf16 %v667_v15, %v665_v41  ;;  %v671_v47 = vmul.f32 %v1598_v60, %v1917_v35  ;;  %1611 = vrcp.f32 %v1135_v32 }
 0x365   : > { %v1602_v22 = vpop.eup %1601  ;;  %v673_v59 = vmul.f32 %v1600_v61, %v1911_v0  ;;  %1613 = vrcp.f32 %v1136_v53 }
 0x366   : > { %1453 = vmatmul.mubr.msk.bf16.vlgmr.msra.gmra.mrb[16].mxu0 %vm680_vm5, %v677_v28  ;;  %v678_v29 = vpack.c.bf16 %v671_v47, %v669_v51  ;;  %v675_v3 = vmul.f32 %v1602_v22, %v1915_v2  ;;  %1615 = vrcp.f32 %v1137_v44 }
 0x367   : > { %1477 = vmatpush3.bf16.msra.mxu0 %v1895_v45  ;;  %1617 = vrcp.f32 %v1138_v4 }
 0x368   : > { %1456 = vmatprep.mubr.msk.bf16.mxu0 %vm680_vm5, %v678_v29  ;;  %1478 = vmatprep.subr.bf16.mxu0 %v2024_v54  ;;  %v679_v1 = vpack.c.bf16 %v675_v3, %v673_v59 }
 0x36a   : > { %v1604_v35 = vpop.eup %1603 }
 0x36b   : > { %v1606_v5 = vpop.eup %1605  ;;  %1479 = vmatpush3.bf16.msra.mxu0 %v2024_v54  ;;  %v1140_v0 = vmul.f32 %v1604_v35, %v1925_v19 }
 0x36c   : > { %v1608_v10 = vpop.eup %1607  ;;  %1480 = vmatprep.subr.bf16.mxu0 %v2052_v16  ;;  %v1142_v2 = vmul.f32 %v1606_v5, %v1929_v23 }
 0x36d   : > { %v1610_v8 = vpop.eup %1609  ;;  %v1144_v45 = vmul.f32 %v1608_v10, %v1923_v18 }
 0x36e   : > { %v1612_v9 = vpop.eup %1611  ;;  %1457 = vmatmul.mubr.msk.bf16.gmra.mrb[20].mxu0 %vm680_vm5, %v679_v1  ;;  %v1155_v13 = vpack.c.bf16 %v1142_v2, %v1140_v0  ;;  %v1146_v14 = vmul.f32 %v1610_v8, %v1927_v21 }
 0x36f   : > { %v1614_v17 = vpop.eup %1613  ;;  %1481 = vmatpush3.bf16.msra.mxu0 %v2052_v16  ;;  %v1148_v54 = vmul.f32 %v1612_v9, %v1933_v31 }
 0x370   : > { %v1616_v19 = vpop.eup %1615  ;;  %1482 = vmatprep.subr.bf16.mxu0 %v2068_v58  ;;  %1484 = vmatprep.mubr.msk.bf16.mxu0 %vm680_vm5, %v1155_v13  ;;  %v1156_v23 = vpack.c.bf16 %v1146_v14, %v1144_v45  ;;  %v1150_v63 = vmul.f32 %v1614_v17, %v1937_v36 }
 0x371   : > { %v1618_v18 = vpop.eup %1617  ;;  %v1152_v55 = vmul.f32 %v1616_v19, %v1931_v26 }
 0x372   : > { %v1157_v34 = vpack.c.bf16 %v1150_v63, %v1148_v54  ;;  %v1154_v38 = vmul.f32 %v1618_v18, %v1935_v33 }
 0x373   : > { %1483 = vmatpush3.bf16.msra.mxu0 %v2068_v58 }
 0x374   : > { %v1158_v21 = vpack.c.bf16 %v1154_v38, %v1152_v55 }
 0x376   : > { %1485 = vmatmul.mubr.msk.bf16.vlgmr.msra.gmra.mrb[24].mxu0 %vm680_vm5, %v1156_v23 }
 0x377   : > { %1488 = vmatprep.mubr.msk.bf16.mxu0 %vm680_vm5, %v1157_v34 }
 0x37e   : > { %1489 = vmatmul.mubr.msk.bf16.gmra.mrb[28].mxu0 %vm680_vm5, %v1158_v21 }
 0x439   : > { %v1454_v31 = vpop.f32.mrb[16].mxu0 }
 0x43a   : > { %v727_v16 = vpop.f32.mrb[17].mxu0 }
 0x43b   : > { %v1455_v37 = vpop.f32.mrb[18].mxu0 }
 0x43c   : > { %v730_v39 = vpop.f32.mrb[19].mxu0 }
 0x441   : > { %v1458_v36 = vpop.f32.mrb[20].mxu0 }
 0x442   : > { %v743_v6 = vpop.f32.mrb[21].mxu0 }
 0x443   : > { %v1459_v46 = vpop.f32.mrb[22].mxu0 }
 0x444   : > { %v746_v26 = vpop.f32.mrb[23].mxu0 }
 0x449   : > { %v1486_v40 = vpop.f32.mrb[24].mxu0 }
 0x44a   : > { %1264 = vrot.lane.b32.xlu0 %v1486_v40, %s1629_s24  ;;  %v1221_v33 = vpop.f32.mrb[25].mxu0 }
 0x44b   : > { %v1487_v58 = vpop.f32.mrb[26].mxu0 }
 0x44c   : > { %v1224_v50 = vpop.f32.mrb[27].mxu0 }
 0x44d   : > { %1262 = vrot.lane.b32.xlu1 %v1224_v50, %s1629_s24 }
 0x44e   : > { %1260 = vrot.lane.b32.xlu0 %v1221_v33, %s1629_s24 }
 0x451   : > { %v1490_v7 = vpop.f32.mrb[28].mxu0 }
 0x452   : > { %1266 = vrot.lane.b32.xlu0 %v1487_v58, %s1629_s24  ;;  %v1237_v56 = vpop.f32.mrb[29].mxu0 }
 0x453   : > { %v1491_v42 = vpop.f32.mrb[30].mxu0 }
 0x454   : > { %v1240_v43 = vpop.f32.mrb[31].mxu0 }
 0x455   : > { %1270 = vrot.lane.b32.xlu1 %v1240_v43, %s1629_s24 }
 0x456   : > { %1268 = vrot.lane.b32.xlu0 %v1237_v56, %s1629_s24 }
 0x459   : > { %1274 = vrot.lane.b32.xlu1 %v1491_v42, %s1629_s24 }
 0x45a   : > { %1272 = vrot.lane.b32.xlu0 %v1490_v7, %s1629_s24 }
 0x4bc   : > { %v1265_v48 = vpop.permute.xlu0 %1264 }
 0x4bd   : > { %v1286_v24 = vsel %vm197_vm0, %v1454_v31, %v1265_v48 }
 0x4be   : > { %1294 = vst.msk [vmem:[%s143_s29 + $0x10] sm:$0xff] %vm680_vm5, %v1286_v24 }
 0x4bf   : > { %v1263_v62 = vpop.permute.xlu1 %1262 }
 0x4c0   : > { %v1285_v49 = vsel %vm197_vm0, %v730_v39, %v1263_v62  ;;  %v1261_v30 = vpop.permute.xlu0 %1260 }
 0x4c1   : > { %1293 = vst.msk [vmem:[%s143_s29 + $0x8] sm:$0xff] %vm680_vm5, %v1285_v49  ;;  %v1284_v52 = vsel %vm197_vm0, %v727_v16, %v1261_v30 }
 0x4c2   : > { %1292 = vst.msk [vmem:[%s143_s29] sm:$0xff] %vm680_vm5, %v1284_v52 }
 0x4c4   : > { %v1267_v27 = vpop.permute.xlu0 %1266 }
 0x4c5   : > { %v1287_v57 = vsel %vm197_vm0, %v1455_v37, %v1267_v27 }
 0x4c6   : > { %1295 = vst.msk [vmem:[%s143_s29 + $0x18] sm:$0xff] %vm680_vm5, %v1287_v57 }
 0x4c7   : > { %v1271_v25 = vpop.permute.xlu1 %1270 }
 0x4c8   : > { %v1289_v32 = vsel %vm197_vm0, %v746_v26, %v1271_v25  ;;  %v1269_v20 = vpop.permute.xlu0 %1268 }
 0x4c9   : > { %1297 = vst.msk [vmem:[%s143_s29 + $0x28] sm:$0xff] %vm680_vm5, %v1289_v32  ;;  %v1288_v41 = vsel %vm197_vm0, %v743_v6, %v1269_v20 }
 0x4ca   : > { %1296 = vst.msk [vmem:[%s143_s29 + $0x20] sm:$0xff] %vm680_vm5, %v1288_v41 }
 0x4cb   : > { %v1275_v53 = vpop.permute.xlu1 %1274 }
 0x4cc   : > { %v1291_v11 = vsel %vm197_vm0, %v1459_v46, %v1275_v53  ;;  %v1273_v12 = vpop.permute.xlu0 %1272 }
 0x4cd   : > { %1299 = vst.msk [vmem:[%s143_s29 + $0x38] sm:$0xff] %vm680_vm5, %v1291_v11  ;;  %v1290_v15 = vsel %vm197_vm0, %v1458_v36, %v1273_v12 }
 0x4ce   : > { %1298 = vst.msk [vmem:[%s143_s29 + $0x30] sm:$0xff] %vm680_vm5, %v1290_v15 }
 0x4cf PF: > { %s12_s9 = sadd.s32 1, %s1625_s9  }
 0x4d0   : > { %p9_p4 = scmp.ge.s32.totalorder %s12_s9, 4  }
 0x4d2   :  { %11 = sbr.rel (!%p9_p4) target bundleno = 1 (0x1), region = 58 }

</bundles_post_ra>
